<compile_context>
chip_gen: v6e
topology: v6e:2x2x1
jax: 0.10.0
libtpu: 0.0.40
codegen_flags: <defaults>
</compile_context>

<pallas_src>
import jax
import jax.numpy as jnp
from jax.experimental import pallas as pl
from jax.experimental.pallas import tpu as pltpu

# ---------------- model dims (synthetic config) -------------------------------
C, H, W = 4, 16, 16
D_IN = C * H * W            # 1024 (flattened start_channel * H * W)
D_MID = 256                 # cfg['end_channel'] analogue
D_LAT = 64                  # logical bottleneck width
D_LAT_PAD = 128             # lane-padded bottleneck used inside the kernel
D_BIAS = D_MID + D_LAT_PAD + D_MID + D_IN   # 1664 = 13 * 128 lanes
BATCH = 64                  # module default TModel(batch_size=64)
MAX_BLOCK_B = 128           # upper bound on batch rows per grid step

# static, 128-lane-aligned slices into the fused bias slab (no layout copies)
_B1 = slice(0, D_MID)
_B2 = slice(D_MID, D_MID + D_LAT_PAD)
_B3 = slice(D_MID + D_LAT_PAD, D_MID + D_LAT_PAD + D_MID)
_B4 = slice(D_MID + D_LAT_PAD + D_MID, D_BIAS)


def _pick_tb(b, max_tb):
    """Pick the batch tile: a multiple-of-8 divisor of b (<= max_tb) that
    yields >= 4 grid steps (so each v7x TensorCore pipelines >= 2 steps);
    fall back to the largest such divisor, then to the full batch (a block
    equal to the full array dim is always legal)."""
    if b % 8 == 0:
        best_any = None
        best_pipelined = None
        cand = 8
        while cand <= min(max_tb, b):
            if b % cand == 0:
                best_any = cand
                if b // cand >= 4:
                    best_pipelined = cand
            cand += 8
        if best_pipelined is not None:
            return best_pipelined
        if best_any is not None:
            return best_any
    return b


# ---------------- Pallas kernel: full encoder+decoder chain -------------------
def _autoencoder_kernel(x_ref,
                        w1_ref, w2_ref, w3_ref, w4_ref,
                        bias_ref,
                        out_ref):
    # encoder: Linear + ReLU, Linear + ReLU   (bf16 MXU inputs, f32 accumulate,
    # f32 element-wise bias/ReLU — v5e-friendly)
    h = x_ref[...].astype(jnp.bfloat16)
    h = jnp.dot(h, w1_ref[...], preferred_element_type=jnp.float32) + bias_ref[:, _B1]
    h = jnp.maximum(h, 0.0).astype(jnp.bfloat16)
    h = jnp.dot(h, w2_ref[...], preferred_element_type=jnp.float32) + bias_ref[:, _B2]
    h = jnp.maximum(h, 0.0).astype(jnp.bfloat16)
    # decoder: Linear + ReLU, Linear
    h = jnp.dot(h, w3_ref[...], preferred_element_type=jnp.float32) + bias_ref[:, _B3]
    h = jnp.maximum(h, 0.0).astype(jnp.bfloat16)
    h = jnp.dot(h, w4_ref[...], preferred_element_type=jnp.float32) + bias_ref[:, _B4]
    out_ref[...] = h.astype(out_ref.dtype)


# ---------------- wrapper ------------------------------------------------------
def tmodel_forward(x_nchw, kernel_params, max_block_b=MAX_BLOCK_B):
    """x_nchw: (B, C, H, W) bf16/f32 -> (B, C*H*W) bf16 reconstruction."""
    b = x_nchw.shape[0]
    # is_linear=True: x.view(B, -1).  Contiguous NCHW -> flat is metadata-only.
    x = x_nchw.reshape(b, -1)

    tb = _pick_tb(b, max_block_b)     # divides b exactly (or == b): no pad pass
    n_b = b // tb

    w1, w2, w3, w4, bias = kernel_params

    act_in_spec = pl.BlockSpec((tb, D_IN), lambda i: (i, 0))
    out_spec = pl.BlockSpec((tb, D_IN), lambda i: (i, 0))

    def resident(arr):
        # full array, constant block index -> DMA'd once, VMEM-resident
        return pl.BlockSpec(arr.shape, lambda i: (0, 0))

    out = pl.pallas_call(
        _autoencoder_kernel,
        out_shape=jax.ShapeDtypeStruct((b, D_IN), jnp.bfloat16),
        grid_spec=pltpu.PrefetchScalarGridSpec(
            num_scalar_prefetch=0,
            grid=(n_b,),
            in_specs=[
                act_in_spec,
                resident(w1), resident(w2), resident(w3), resident(w4),
                resident(bias),
            ],
            out_specs=out_spec,
        ),
        compiler_params=pltpu.CompilerParams(
            # batch steps are independent -> megacore split on v7x
            dimension_semantics=("parallel",),
        ),
    )(x, w1, w2, w3, w4, bias)
    return out


# ---------------- deterministic parameter init ---------------------------------
def init_params(key):
    ks = jax.random.split(key, 4)

    def linear(k, d_in, d_out):
        # PyTorch-style uniform(-1/sqrt(d_in), 1/sqrt(d_in)) init, deterministic
        bound = 1.0 / jnp.sqrt(jnp.float32(d_in))
        kw, kb = jax.random.split(k)
        w = jax.random.uniform(kw, (d_in, d_out), jnp.float32, -bound, bound)
        b = jax.random.uniform(kb, (1, d_out), jnp.float32, -bound, bound)
        return w, b

    return (
        linear(ks[0], D_IN, D_MID),    # encoder layer 1
        linear(ks[1], D_MID, D_LAT),   # encoder layer 2
        linear(ks[2], D_LAT, D_MID),   # decoder layer 1
        linear(ks[3], D_MID, D_IN),    # decoder layer 2
    )


def prepare_params(params_f32):
    """bf16 weights, one fused f32 bias slab, bottleneck zero-padded 64 -> 128."""
    (w1, b1), (w2, b2), (w3, b3), (w4, b4) = params_f32
    pad = D_LAT_PAD - D_LAT
    w2p = jnp.pad(w2, ((0, 0), (0, pad)))       # extra cols -> pre-act 0 -> ReLU 0
    b2p = jnp.pad(b2, ((0, 0), (0, pad)))
    w3p = jnp.pad(w3, ((0, pad), (0, 0)))       # zero rows -> no contribution
    bias = jnp.concatenate(
        [b1, b2p, b3, b4], axis=1).astype(jnp.float32)        # (1, 1664)
    return (
        w1.astype(jnp.bfloat16),
        w2p.astype(jnp.bfloat16),
        w3p.astype(jnp.bfloat16),
        w4.astype(jnp.bfloat16),
        bias,
    )


# ---------------- pure-JAX reference (same mixed-precision flow) ---------------
def reference_forward(x_nchw, params_f32):
    # NOTE: bf16 weights/activations deviate from a pure-f32 PyTorch Linear
    # stack at the ~1e-2 level; acceptable for this autoencoder demo.
    x = x_nchw.reshape(x_nchw.shape[0], -1)
    (w1, b1), (w2, b2), (w3, b3), (w4, b4) = params_f32

    def lin(h, w, bias):
        return jnp.dot(h.astype(jnp.bfloat16), w.astype(jnp.bfloat16),
                       preferred_element_type=jnp.float32) + bias

    h = jnp.maximum(lin(x, w1, b1), 0.0)
    h = jnp.maximum(lin(h, w2, b2), 0.0)
    h = jnp.maximum(lin(h, w3, b3), 0.0)
    return lin(h, w4, b4)                                      # f32


if __name__ == "__main__":
    key = jax.random.PRNGKey(0)
    k_x, k_p = jax.random.split(key)
    # bf16 producer: the kernel interface is bf16-in / bf16-out (no extra
    # wrapper cast pass).
    x = jax.random.normal(k_x, (BATCH, C, H, W), jnp.float32).astype(jnp.bfloat16)
    params_f32 = init_params(k_p)
    kernel_params = prepare_params(params_f32)

    out = tmodel_forward(x, kernel_params)
    out = jax.block_until_ready(out)

    ref = reference_forward(x, params_f32)
    assert out.shape == (BATCH, D_IN), out.shape
    assert out.dtype == jnp.bfloat16, out.dtype
    max_err = float(jnp.max(jnp.abs(out.astype(jnp.float32) - ref)))
    assert max_err < 5e-2, max_err

    print("KERNEL_OK")
</pallas_src>

<mosaic_0001>
module attributes {stable_mosaic.version = 11 : i64} {
  func.func @_autoencoder_kernel(%arg0: i32, %arg1: memref<16x1024xbf16, #tpu.memory_space<vmem>>, %arg2: memref<1024x256xbf16, #tpu.memory_space<vmem>>, %arg3: memref<256x128xbf16, #tpu.memory_space<vmem>>, %arg4: memref<128x256xbf16, #tpu.memory_space<vmem>>, %arg5: memref<256x1024xbf16, #tpu.memory_space<vmem>>, %arg6: memref<1x1664xf32, #tpu.memory_space<vmem>>, %arg7: memref<16x1024xbf16, #tpu.memory_space<vmem>>) attributes {dimension_semantics = [#tpu.dimension_semantics<parallel>], iteration_bounds = array<i64: 4>, scalar_prefetch = 0 : i64, scratch_operands = 0 : i64, tpu.core_type = #tpu.core_type<tc>, window_params = [{transform_indices = @transform_0, window_bounds = array<i64: 16, 1024>}, {pipeline_mode = #tpu.pipeline_mode<synchronous>, transform_indices = @transform_1, window_bounds = array<i64: 1024, 256>}, {pipeline_mode = #tpu.pipeline_mode<synchronous>, transform_indices = @transform_2, window_bounds = array<i64: 256, 128>}, {pipeline_mode = #tpu.pipeline_mode<synchronous>, transform_indices = @transform_3, window_bounds = array<i64: 128, 256>}, {pipeline_mode = #tpu.pipeline_mode<synchronous>, transform_indices = @transform_4, window_bounds = array<i64: 256, 1024>}, {pipeline_mode = #tpu.pipeline_mode<synchronous>, transform_indices = @transform_5, window_bounds = array<i64: 1, 1664>}, {transform_indices = @transform_6, window_bounds = array<i64: 16, 1024>}]} {
    %c0 = arith.constant 0 : index
    %c0_0 = arith.constant 0 : index
    %0 = vector.load %arg1[%c0, %c0_0] : memref<16x1024xbf16, #tpu.memory_space<vmem>>, vector<16x1024xbf16>
    %c0_1 = arith.constant 0 : index
    %c0_2 = arith.constant 0 : index
    %1 = vector.load %arg2[%c0_1, %c0_2] : memref<1024x256xbf16, #tpu.memory_space<vmem>>, vector<1024x256xbf16>
    %cst = arith.constant dense<0.000000e+00> : vector<16x256xf32>
    %2 = tpu.matmul %0, %1, %cst {dimension_numbers = #tpu.dot_dimension_numbers<[1], [0], [0], [1], [0, 0, 1, 1], [], []>} : vector<16x1024xbf16>, vector<1024x256xbf16>, vector<16x256xf32> -> vector<16x256xf32>
    %c0_3 = arith.constant 0 : index
    %c0_4 = arith.constant 0 : index
    %3 = vector.load %arg6[%c0_3, %c0_4] : memref<1x1664xf32, #tpu.memory_space<vmem>>, vector<1x256xf32>
    %4 = vector.broadcast %3 : vector<1x256xf32> to vector<16x256xf32>
    %5 = arith.addf %2, %4 : vector<16x256xf32>
    %cst_5 = arith.constant 0.000000e+00 : f32
    %6 = vector.broadcast %cst_5 : f32 to vector<16x256xf32>
    %7 = arith.maximumf %5, %6 : vector<16x256xf32>
    %8 = arith.truncf %7 : vector<16x256xf32> to vector<16x256xbf16>
    %c0_6 = arith.constant 0 : index
    %c0_7 = arith.constant 0 : index
    %9 = vector.load %arg3[%c0_6, %c0_7] : memref<256x128xbf16, #tpu.memory_space<vmem>>, vector<256x128xbf16>
    %cst_8 = arith.constant dense<0.000000e+00> : vector<16x128xf32>
    %10 = tpu.matmul %8, %9, %cst_8 {dimension_numbers = #tpu.dot_dimension_numbers<[1], [0], [0], [1], [0, 0, 1, 1], [], []>} : vector<16x256xbf16>, vector<256x128xbf16>, vector<16x128xf32> -> vector<16x128xf32>
    %c0_9 = arith.constant 0 : index
    %c256 = arith.constant 256 : index
    %11 = vector.load %arg6[%c0_9, %c256] : memref<1x1664xf32, #tpu.memory_space<vmem>>, vector<1x128xf32>
    %12 = vector.broadcast %11 : vector<1x128xf32> to vector<16x128xf32>
    %13 = arith.addf %10, %12 : vector<16x128xf32>
    %cst_10 = arith.constant 0.000000e+00 : f32
    %14 = vector.broadcast %cst_10 : f32 to vector<16x128xf32>
    %15 = arith.maximumf %13, %14 : vector<16x128xf32>
    %16 = arith.truncf %15 : vector<16x128xf32> to vector<16x128xbf16>
    %c0_11 = arith.constant 0 : index
    %c0_12 = arith.constant 0 : index
    %17 = vector.load %arg4[%c0_11, %c0_12] : memref<128x256xbf16, #tpu.memory_space<vmem>>, vector<128x256xbf16>
    %cst_13 = arith.constant dense<0.000000e+00> : vector<16x256xf32>
    %18 = tpu.matmul %16, %17, %cst_13 {dimension_numbers = #tpu.dot_dimension_numbers<[1], [0], [0], [1], [0, 0, 1, 1], [], []>} : vector<16x128xbf16>, vector<128x256xbf16>, vector<16x256xf32> -> vector<16x256xf32>
    %c0_14 = arith.constant 0 : index
    %c384 = arith.constant 384 : index
    %19 = vector.load %arg6[%c0_14, %c384] : memref<1x1664xf32, #tpu.memory_space<vmem>>, vector<1x256xf32>
    %20 = vector.broadcast %19 : vector<1x256xf32> to vector<16x256xf32>
    %21 = arith.addf %18, %20 : vector<16x256xf32>
    %cst_15 = arith.constant 0.000000e+00 : f32
    %22 = vector.broadcast %cst_15 : f32 to vector<16x256xf32>
    %23 = arith.maximumf %21, %22 : vector<16x256xf32>
    %24 = arith.truncf %23 : vector<16x256xf32> to vector<16x256xbf16>
    %c0_16 = arith.constant 0 : index
    %c0_17 = arith.constant 0 : index
    %25 = vector.load %arg5[%c0_16, %c0_17] : memref<256x1024xbf16, #tpu.memory_space<vmem>>, vector<256x1024xbf16>
    %cst_18 = arith.constant dense<0.000000e+00> : vector<16x1024xf32>
    %26 = tpu.matmul %24, %25, %cst_18 {dimension_numbers = #tpu.dot_dimension_numbers<[1], [0], [0], [1], [0, 0, 1, 1], [], []>} : vector<16x256xbf16>, vector<256x1024xbf16>, vector<16x1024xf32> -> vector<16x1024xf32>
    %c0_19 = arith.constant 0 : index
    %c640 = arith.constant 640 : index
    %27 = vector.load %arg6[%c0_19, %c640] : memref<1x1664xf32, #tpu.memory_space<vmem>>, vector<1x1024xf32>
    %28 = vector.broadcast %27 : vector<1x1024xf32> to vector<16x1024xf32>
    %29 = arith.addf %26, %28 : vector<16x1024xf32>
    %30 = arith.truncf %29 : vector<16x1024xf32> to vector<16x1024xbf16>
    %c0_20 = arith.constant 0 : index
    %c0_21 = arith.constant 0 : index
    %31 = vector.load %arg7[%c0_20, %c0_21] : memref<16x1024xbf16, #tpu.memory_space<vmem>>, vector<16x1024xbf16>
    tpu.vector_store %arg7[%c0_20, %c0_21], %30 {strides = array<i32>} : memref<16x1024xbf16, #tpu.memory_space<vmem>>, vector<16x1024xbf16>,
    return
  }
  func.func @transform_0(%arg0: i32) -> (i32, i32) {
    %c0_i32 = arith.constant 0 : i32
    %c0_i32_0 = arith.constant 0 : i32
    return %arg0, %c0_i32 : i32, i32
  }
  func.func @transform_1(%arg0: i32) -> (i32, i32) {
    %c0_i32 = arith.constant 0 : i32
    %c0_i32_0 = arith.constant 0 : i32
    %c0_i32_1 = arith.constant 0 : i32
    return %c0_i32, %c0_i32_0 : i32, i32
  }
  func.func @transform_2(%arg0: i32) -> (i32, i32) {
    %c0_i32 = arith.constant 0 : i32
    %c0_i32_0 = arith.constant 0 : i32
    %c0_i32_1 = arith.constant 0 : i32
    return %c0_i32, %c0_i32_0 : i32, i32
  }
  func.func @transform_3(%arg0: i32) -> (i32, i32) {
    %c0_i32 = arith.constant 0 : i32
    %c0_i32_0 = arith.constant 0 : i32
    %c0_i32_1 = arith.constant 0 : i32
    return %c0_i32, %c0_i32_0 : i32, i32
  }
  func.func @transform_4(%arg0: i32) -> (i32, i32) {
    %c0_i32 = arith.constant 0 : i32
    %c0_i32_0 = arith.constant 0 : i32
    %c0_i32_1 = arith.constant 0 : i32
    return %c0_i32, %c0_i32_0 : i32, i32
  }
  func.func @transform_5(%arg0: i32) -> (i32, i32) {
    %c0_i32 = arith.constant 0 : i32
    %c0_i32_0 = arith.constant 0 : i32
    %c0_i32_1 = arith.constant 0 : i32
    return %c0_i32, %c0_i32_0 : i32, i32
  }
  func.func @transform_6(%arg0: i32) -> (i32, i32) {
    %c0_i32 = arith.constant 0 : i32
    %c0_i32_0 = arith.constant 0 : i32
    return %arg0, %c0_i32 : i32, i32
  }
}

</mosaic_0001>

<bundles_post_ra>
// kernel: tpu_custom_call.1
= control target key start
LH: loop header
LB: loop body
LE: loop exit
PB: predicated region body
PF: predicated region fallthrough
CT: control target
= control target key end

     0   :  { %11 = vsyncpa [#allocation3], 0  ;;  %s4164_s0 = inlined_call_operand.hbm [shape: bf16[64,1024], index: 0, kind: input, shape index: {}]   ;;  %s4165_s1 = inlined_call_operand.hbm [shape: bf16[1024,256], index: 1, kind: input, shape index: {}]   ;;  %s4166_s2 = inlined_call_operand.hbm [shape: bf16[256,128], index: 2, kind: input, shape index: {}]   ;;  %s4167_s3 = inlined_call_operand.hbm [shape: bf16[128,256], index: 3, kind: input, shape index: {}]   ;;  %s4168_s4 = inlined_call_operand.hbm [shape: bf16[256,1024], index: 4, kind: input, shape index: {}]   ;;  %s4169_s5 = inlined_call_operand.hbm [shape: f32[1,1664], index: 5, kind: input, shape index: {}]   ;;  %s4170_s6 = inlined_call_operand.hbm [shape: bf16[64,1024], index: 6, kind: output, shape index: {}]  }
   0x1   :  { %13 = vsyncpa [#allocation3 + $0x1], 0 }
   0x2   :  { %14 = vsyncpa [#allocation6], 0 }
   0x3   :  { %15 = vsyncpa [#allocation9], 0 }
   0x4   :  { %16 = vsyncpa [#allocation12], 0 }
   0x5   :  { %17 = vsyncpa [#allocation4], 0 }
   0x6   :  { %19 = vsyncpa [#allocation4 + $0x1], 0  ;;  %s3851_s21 = smov 0   ;;  %s3853_s22 = smov 0  }
   0x7   :  { %s3855_s23 = smov 0   ;;  %s3857_s24 = smov 0  }
   0x8 LB: > { %s3800_s25 = smov [#allocation5]   ;;  %s3872_s27 = sadd.s32 4294967295, %s3798_s24   ;;  %s3798_s24 = sphi %s3857_s24, %s4199_s24   ;;  %s3794_s23 = sphi %s3855_s23, %s4198_s23   ;;  %s3790_s22 = sphi %s3853_s22, %s4197_s22   ;;  %s3786_s21 = sphi %s3851_s21, %s4196_s21  }
   0x9   : > { %s199_s26 = sshll.u32 %s3800_s25, 4  ;;  %p2862_p0 = scmp.ge.s32.totalorder %s3798_s24, 1  ;;  %s200_s26 = int_to_ptr.vmem [resolvable:$true] %s199_s26 }
   0xa   : > { %p4171_p1 = scmp.eq.s32.totalorder %s3872_s27, 0  ;;  %p187_p2 = scmp.lt.s32.totalorder %s3798_s24, 5 }
   0xb   : > { %s3801_s29 = smov [#allocation8]   ;;  %s3802_s8 = smov [#allocation7]  }
   0xc   : > { %p3877_p3 = pnand %p2862_p0, %p187_p2  ;;  %s225_s30 = sshll.u32 %s3801_s29, 4  ;;  %s3889_s30 = int_to_ptr.vmem [resolvable:$true] %s225_s30 }
   0xd   : > { %s212_s9 = sshll.u32 %s3802_s8, 4  ;;  %s3575_s11 = scalar_lea.vmem %s200_s26, 16384  ;;  %s3891_s9 = int_to_ptr.vmem [resolvable:$true] %s212_s9 }
   0xe   : > { %s4177_s28 = scalar_select %p3877_p3, 1, 0 }
   0xf   : > { %p3250_p4 = pneg %p3877_p3  ;;  %p3576_p7 = scmp.ne.s32.totalorder %s200_s26, %s3575_s11 }
  0x10   : > { %p3583_p10 = scmp.lt.s32.totalorder %s200_s26, %s200_s26  ;;  %p3584_p11 = scmp.lt.s32.totalorder %s3575_s11, %s3575_s11 }
  0x11   : > { %p3885_p5 = pnand %p3250_p4, %p4171_p1 }
  0x12   : > { %p3585_p12 = por %p3584_p11, %p3583_p10 }
  0x13   : > { %p3895_p6 = pneg %p3885_p5 }
  0x15   : > { %p3578_p8 = pnand %p3576_p7, %p3895_p6 }
  0x17   : > { %p3579_p9 = pneg %p3578_p8 }
  0x19   : > { %p3586_p13 = pnand %p3585_p12, %p3579_p9 }
  0x1b   : > { %3589 = shalt.err (!%p3586_p13)
}
  0x1c   : > { %s3803_s12 = smov 128   ;;  %s3804_s13 = smov 8  }
  0x1d   : > { %3253 = dma.hbm_to_vmem [thread:$0]  (!%p3885_p5), %s4165_s1, 16384, %s200_s26, [#allocation6], %s3803_s12, %s3803_s12, %s3804_s13  }
  0x1e   : > { %s3601_s16 = scalar_lea.vmem %s3889_s30, 2048  ;;  %p3609_p7 = scmp.lt.s32.totalorder %s3889_s30, %s3889_s30 }
  0x1f   : > { %p3602_p0 = scmp.ne.s32.totalorder %s3889_s30, %s3601_s16  ;;  %p3610_p8 = scmp.lt.s32.totalorder %s3601_s16, %s3601_s16 }
  0x21   : > { %p3604_p2 = pnand %p3602_p0, %p3895_p6  ;;  %p3611_p9 = por %p3610_p8, %p3609_p7 }
  0x23   : > { %p3605_p4 = pneg %p3604_p2 }
  0x25   : > { %p3612_p10 = pnand %p3611_p9, %p3605_p4 }
  0x27   : > { %3615 = shalt.err (!%p3612_p10)
}
  0x28   : > { %3259 = dma.hbm_to_vmem [thread:$0]  (!%p3885_p5), %s4167_s3, 2048, %s3889_s30, [#allocation9], %s3803_s12, %s3803_s12, %s3804_s13  }
  0x29   : > { %s3627_s19 = scalar_lea.vmem %s3891_s9, 2048  ;;  %p3635_p0 = scmp.lt.s32.totalorder %s3891_s9, %s3891_s9 }
  0x2a   : > { %p3628_p11 = scmp.ne.s32.totalorder %s3891_s9, %s3627_s19  ;;  %p3636_p2 = scmp.lt.s32.totalorder %s3627_s19, %s3627_s19 }
  0x2c   : > { %p3630_p12 = pnand %p3628_p11, %p3895_p6  ;;  %p3637_p4 = por %p3636_p2, %p3635_p0 }
  0x2e   : > { %p3631_p13 = pneg %p3630_p12 }
  0x30   : > { %p3638_p7 = pnand %p3637_p4, %p3631_p13 }
  0x32   : > { %3641 = shalt.err (!%p3638_p7)
}
  0x33   : > { %s3805_s20 = smov 64   ;;  %s3806_s25 = smov 4  }
  0x34   : > { %3256 = dma.hbm_to_vmem [thread:$0]  (!%p3885_p5), %s4166_s2, 2048, %s3891_s9, [#allocation6], %s3805_s20, %s3805_s20, %s3806_s25  }
  0x35   : > { %s3807_s30 = smov [#allocation10]  }
  0x36   : > { %s238_s8 = sshll.u32 %s3807_s30, 4  ;;  %s239_s8 = int_to_ptr.vmem [resolvable:$true] %s238_s8 }
  0x37   : > { %s3653_s11 = scalar_lea.vmem %s239_s8, 16384  ;;  %p3661_p11 = scmp.lt.s32.totalorder %s239_s8, %s239_s8 }
  0x38   : > { %p3654_p8 = scmp.ne.s32.totalorder %s239_s8, %s3653_s11  ;;  %p3662_p12 = scmp.lt.s32.totalorder %s3653_s11, %s3653_s11 }
  0x3a   : > { %p3656_p9 = pnand %p3654_p8, %p3895_p6  ;;  %p3663_p13 = por %p3662_p12, %p3661_p11 }
  0x3c   : > { %p3657_p10 = pneg %p3656_p9 }
  0x3e   : > { %p3664_p0 = pnand %p3663_p13, %p3657_p10 }
  0x40   : > { %3667 = shalt.err (!%p3664_p0)
}
  0x41   : > { %s4172_s12 = smov 512   ;;  %s4173_s13 = smov 32  }
  0x42   : > { %3262 = dma.hbm_to_vmem [thread:$0]  (!%p3885_p5), %s4168_s4, 16384, %s239_s8, [#allocation9], %s4172_s12, %s4172_s12, %s4173_s13  }
  0x43   : > { %s3810_s15 = smov [#allocation11]  }
  0x44   : > { %s252_s16 = sshll.u32 %s3810_s15, 4  ;;  %s253_s16 = int_to_ptr.vmem [resolvable:$true] %s252_s16 }
  0x45   : > { %s3679_s17 = scalar_lea.vmem %s253_s16, 208  ;;  %s3686_s18 = scalar_lea.vmem %s253_s16, 224 }
  0x46   : > { %p3680_p2 = scmp.ne.s32.totalorder %s253_s16, %s3679_s17  ;;  %p3687_p8 = scmp.lt.s32.totalorder %s253_s16, %s253_s16 }
  0x47   : > { %p3688_p9 = scmp.lt.s32.totalorder %s3686_s18, %s3679_s17 }
  0x48   : > { %p3682_p4 = pnand %p3680_p2, %p3895_p6 }
  0x49   : > { %p3689_p10 = por %p3688_p9, %p3687_p8 }
  0x4a   : > { %p3683_p7 = pneg %p3682_p4 }
  0x4c   : > { %p3690_p11 = pnand %p3689_p10, %p3683_p7 }
  0x4e   : > { %3693 = shalt.err (!%p3690_p11)
}
  0x4f   : > { %3265 = dma.hbm_to_vmem [thread:$0]  (!%p3885_p5), %s4169_s5, 208, %s253_s16, [#allocation12]  }
  0x50   : > { %s2861_s10 = sadd.s32 4294967294, %s3798_s24   ;;  %s3949_s7 = sadd.s32 1, %s3798_s24  }
  0x51   : > { %s32_s25 = sadd.s32 1, %s3794_s23  ;;  %s29_s26 = ssub.s32 %s3798_s24, %s3949_s7 }
  0x52   : > { %p39_p6 = scmp.ne.s32.totalorder %s3794_s23, %s3790_s22  ;;  %p30_p12 = scmp.eq.s32.totalorder %s29_s26, 0 }
  0x53   : > { %p40_p13 = scmp.eq.s32.totalorder %s3798_s24, 0  ;;  %p45_p0 = scmp.ne.s32.totalorder %s3790_s22, %s3786_s21 }
  0x54   : > { %p174_p2 = scmp.eq.s32.totalorder %s3872_s27, 3  ;;  %p180_p8 = scmp.eq.s32.totalorder %s2861_s10, 3 }
  0x55   : > { %s3961_s29 = scalar_select %p30_p12, %s3794_s23, %s32_s25  }
  0x56   : > { %p41_p4 = por %p40_p13, %p39_p6  ;;  %p3965_p7 = por %p4171_p1, %p45_p0 }
  0x57   : > { %p3969_p5 = por %p174_p2, %p39_p6  ;;  %p3279_p9 = scmp.lt.s32.totalorder %s3798_s24, 4 }
  0x58   : > { %s4180_s30 = scalar_select %p3965_p7, 1, 0 }
  0x59   : > { %s4181_s8 = scalar_select %p3969_p5, 1, 0 }
  0x5a   : > { %s263_s11 = sand.u32 1, %s3794_s23   ;;  %p3975_p10 = por %p180_p8, %p45_p0 }
  0x5b   : > { %s2869_s14 = sshll.u32 %s263_s11, 6  ;;  %s3193_s15 = sshll.u32 %s3798_s24, 10 }
  0x5c   : > { %s4182_s9 = scalar_select %p3975_p10, 1, 0 }
  0x5d   : > { %s3983_s18 = scalar_lea.hbm %s4164_s0, %s3193_s15  ;;  %s267_s19 = scalar_lea.vmem [#allocation2], %s2869_s14 }
  0x5e   : > { %s275_s20 = sshll.u32 %s267_s19, 4  ;;  %p3985_p11 = pnand %p3279_p9, %p41_p4  ;;  %s3989_s20 = int_to_ptr.vmem [resolvable:$true] %s275_s20 }
  0x5f   : > { %s3991_s25 = scalar_lea.sflag [#allocation3], %s263_s11  ;;  %s3694_s26 = scalar_lea.hbm %s3983_s18, 1024 }
  0x60   : > { %p3695_p6 = scmp.ne.s32.totalorder %s3983_s18, %s3694_s26  ;;  %p3696_p12 = pneg %p3985_p11 }
  0x61   : > { %s3699_s14 = scalar_lea.hbm %s4164_s0, 4096  ;;  %p3700_p2 = scmp.lt.s32.totalorder %s3983_s18, %s4164_s0 }
  0x62   : > { %p3697_p13 = pnand %p3696_p12, %p3695_p6  ;;  %p3701_p4 = scmp.lt.s32.totalorder %s3699_s14, %s3694_s26 }
  0x64   : > { %p3698_p0 = pneg %p3697_p13  ;;  %p3702_p8 = por %p3701_p4, %p3700_p2 }
  0x66   : > { %p3703_p9 = pnand %p3702_p8, %p3698_p0 }
  0x68   : > { %3706 = shalt.err (!%p3703_p9)
}
  0x69   : > { %s3707_s11 = scalar_lea.vmem %s3989_s20, 1024  ;;  %s3811_s12 = smov [#allocation2]  }
  0x6a   : > { %p3708_p1 = scmp.ne.s32.totalorder %s3989_s20, %s3707_s11  ;;  %s3712_s13 = sshll.u32 %s3811_s12, 4  ;;  %s3713_s13 = int_to_ptr.vmem [resolvable:$false] %s3712_s13 }
  0x6b   : > { %s3714_s15 = scalar_lea.vmem %s3713_s13, 2048  ;;  %p3715_p13 = scmp.lt.s32.totalorder %s3989_s20, %s3713_s13 }
  0x6c   : > { %p3710_p10 = pnand %p3708_p1, %p3696_p12  ;;  %p3716_p5 = scmp.lt.s32.totalorder %s3714_s15, %s3707_s11 }
  0x6e   : > { %p3711_p6 = pneg %p3710_p10  ;;  %p3717_p7 = por %p3716_p5, %p3715_p13 }
  0x70   : > { %p3718_p3 = pnand %p3717_p7, %p3711_p6 }
  0x72   : > { %3721 = shalt.err (!%p3718_p3)
}
  0x73   : > { %s4184_s26 = smov 32   ;;  %s4185_s16 = smov 512  }
  0x74   : > { %3269 = dma.hbm_to_vmem [thread:$0]  (!%p3985_p11), %s3983_s18, 1024, %s3989_s20, %s3991_s25, %s4185_s16, %s4185_s16, %s4184_s26  }
  0x75   : > { %p4186_p1 = scmp.ne.s32.totalorder %s4177_s28, 0 }
  0x76   : > { %s4018_s12 = sand.u32 (!%p4186_p1), 1, %s3790_s22   ;;  %p4187_p3 = scmp.ne.s32.totalorder (!%p4186_p1), %s4180_s30, 0 }
  0x77   : > { %287 = sbr.rel (%p4186_p1) target bundleno = 1166 (0x48e), region = 44  ;;  %s2874_s13 = sshll.u32 (!%p4186_p1), %s4018_s12, 6 }
  0x78   : > { %s290_s14 = scalar_lea.sflag (!%p4186_p1), [#allocation3], %s4018_s12  ;;  %s4024_s10 = scalar_lea.vmem (!%p4186_p1), [#allocation2], %s2874_s13 }
  0x7c   : > { %3765 = dma.done.wait (%p4187_p3), %s290_s14, 1024  }
  0x7d   : > { %3767 = vsyncadd (%p4187_p3), %s290_s14, 4294966272  ;;  %p4188_p7 = scmp.eq.s32.totalorder %s3872_s27, 0 }
  0x7f   : > { %3769 = dma.done.wait (%p4188_p7), [#allocation6], 18432   ;;  %p4189_p5 = pmov %p4188_p7 }
  0x81   : > { %3771 = vsyncadd (%p4189_p5), [#allocation6], 4294948864  ;;  %p4190_p10 = pmov %p4189_p5 }
  0x82   : > { %p4191_p11 = pmov %p4189_p5 }
  0x83   : > { %3773 = dma.done.wait (%p4190_p10), [#allocation9], 18432  }
  0x84   : > { %3775 = vsyncadd (%p4191_p11), [#allocation9], 4294948864  ;;  %p4192_p12 = pmov %p4189_p5 }
  0x85   : > { %p4193_p0 = pmov %p4189_p5 }
  0x86   : > { %3777 = dma.done.wait (%p4192_p12), [#allocation12], 208  }
  0x87   : > { %3779 = vsyncadd (%p4193_p0), [#allocation12], 4294967088  ;;  %v3332_v0 = vld [vmem:[#allocation5 + $0x74] ss:$8 sps:$4 sm:$0xff]   ;;  %v3336_v2 = vld [vmem:[#allocation5 + $0x70] ss:$8 sps:$4 sm:$0xff]  }
  0x88   : > { %v3334_v1 = vld [vmem:[#allocation5 + $0x174] ss:$8 sps:$4 sm:$0xff]   ;;  %1173 = vmatprep.subr.bf16.mxu0 %v3332_v0  ;;  %v3337_v3 = vld [vmem:[#allocation5 + $0x170] ss:$8 sps:$4 sm:$0xff]   ;;  %v3338_v4 = vld [vmem:[#allocation5 + $0x64] ss:$8 sps:$4 sm:$0xff]  }
  0x89   : > { %1216 = vmatprep.subr.bf16.mxu1 %v3334_v1  ;;  %1174 = vmatpush1.bf16.msra.mxu0 %v3336_v2  ;;  %v3340_v5 = vld [vmem:[#allocation5 + $0x164] ss:$8 sps:$4 sm:$0xff]   ;;  %v3342_v6 = vld [vmem:[#allocation5 + $0x60] ss:$8 sps:$4 sm:$0xff]   ;;  %v3344_v8 = vld [vmem:[#allocation5 + $0x54] ss:$8 sps:$4 sm:$0xff]  }
  0x8a   : > { %1217 = vmatpush1.bf16.msra.mxu1 %v3337_v3  ;;  %1175 = vmatprep.subr.bf16.mxu0 %v3338_v4  ;;  %v3343_v7 = vld [vmem:[#allocation5 + $0x160] ss:$8 sps:$4 sm:$0xff]   ;;  %v3346_v9 = vld [vmem:[#allocation5 + $0x154] ss:$8 sps:$4 sm:$0xff]   ;;  %v3348_v10 = vld [vmem:[#allocation5 + $0x50] ss:$8 sps:$4 sm:$0xff]  }
  0x8b   : > { %1218 = vmatprep.subr.bf16.mxu1 %v3340_v5  ;;  %v3349_v11 = vld [vmem:[#allocation5 + $0x150] ss:$8 sps:$4 sm:$0xff]   ;;  %v3350_v12 = vld [vmem:[#allocation5 + $0x44] ss:$8 sps:$4 sm:$0xff]   ;;  %v3354_v14 = vld [vmem:[#allocation5 + $0x40] ss:$8 sps:$4 sm:$0xff]  }
  0x8c   : > { %v3352_v13 = vld [vmem:[#allocation5 + $0x144] ss:$8 sps:$4 sm:$0xff]   ;;  %v3355_v15 = vld [vmem:[#allocation5 + $0x140] ss:$8 sps:$4 sm:$0xff]   ;;  %v3356_v16 = vld [vmem:[#allocation5 + $0x34] ss:$8 sps:$4 sm:$0xff]  }
  0x8d   : > { %1176 = vmatpush1.bf16.msra.mxu0 %v3342_v6  ;;  %v3358_v17 = vld [vmem:[#allocation5 + $0x134] ss:$8 sps:$4 sm:$0xff]   ;;  %v3360_v18 = vld [vmem:[#allocation5 + $0x30] ss:$8 sps:$4 sm:$0xff]   ;;  %v3362_v20 = vld [vmem:[#allocation5 + $0x24] ss:$8 sps:$4 sm:$0xff]  }
  0x8e   : > { %1219 = vmatpush1.bf16.msra.mxu1 %v3343_v7  ;;  %1177 = vmatprep.subr.bf16.mxu0 %v3344_v8  ;;  %v3361_v19 = vld [vmem:[#allocation5 + $0x130] ss:$8 sps:$4 sm:$0xff]   ;;  %v3364_v21 = vld [vmem:[#allocation5 + $0x124] ss:$8 sps:$4 sm:$0xff]   ;;  %v3366_v22 = vld [vmem:[#allocation5 + $0x20] ss:$8 sps:$4 sm:$0xff]  }
  0x8f   : > { %1220 = vmatprep.subr.bf16.mxu1 %v3346_v9  ;;  %v3367_v23 = vld [vmem:[#allocation5 + $0x120] ss:$8 sps:$4 sm:$0xff]   ;;  %v3368_v24 = vld [vmem:[#allocation5 + $0x14] ss:$8 sps:$4 sm:$0xff]   ;;  %v3372_v26 = vld [vmem:[#allocation5 + $0x10] ss:$8 sps:$4 sm:$0xff]  }
  0x90   : > { %v3370_v25 = vld [vmem:[#allocation5 + $0x114] ss:$8 sps:$4 sm:$0xff]   ;;  %v3373_v27 = vld [vmem:[#allocation5 + $0x110] ss:$8 sps:$4 sm:$0xff]   ;;  %v3374_v28 = vld [vmem:[#allocation5 + $0x4] ss:$8 sps:$4 sm:$0xff]  }
  0x91   : > { %1178 = vmatpush1.bf16.msra.mxu0 %v3348_v10  ;;  %v3376_v29 = vld [vmem:[#allocation5 + $0x104] ss:$8 sps:$4 sm:$0xff]   ;;  %v3378_v30 = vld [vmem:[#allocation5] ss:$8 sps:$4 sm:$0xff]   ;;  %v3380_v32 = vld [vmem:[#allocation5 + $0xf4] ss:$8 sps:$4 sm:$0xff]  }
  0x92   : > { %1221 = vmatpush1.bf16.msra.mxu1 %v3349_v11  ;;  %1179 = vmatprep.subr.bf16.mxu0 %v3350_v12  ;;  %v3379_v31 = vld [vmem:[#allocation5 + $0x100] ss:$8 sps:$4 sm:$0xff]   ;;  %v3382_v33 = vld [vmem:[#allocation5 + $0x1f4] ss:$8 sps:$4 sm:$0xff]   ;;  %v3384_v34 = vld [vmem:[#allocation5 + $0xf0] ss:$8 sps:$4 sm:$0xff]  }
  0x93   : > { %1222 = vmatprep.subr.bf16.mxu1 %v3352_v13  ;;  %v3385_v35 = vld [vmem:[#allocation5 + $0x1f0] ss:$8 sps:$4 sm:$0xff]   ;;  %v3386_v36 = vld [vmem:[#allocation5 + $0xe4] ss:$8 sps:$4 sm:$0xff]   ;;  %v3390_v38 = vld [vmem:[#allocation5 + $0xe0] ss:$8 sps:$4 sm:$0xff]  }
  0x94   : > { %v3388_v37 = vld [vmem:[#allocation5 + $0x1e4] ss:$8 sps:$4 sm:$0xff]   ;;  %v3391_v39 = vld [vmem:[#allocation5 + $0x1e0] ss:$8 sps:$4 sm:$0xff]   ;;  %v3392_v40 = vld [vmem:[#allocation5 + $0xd4] ss:$8 sps:$4 sm:$0xff]  }
  0x95   : > { %1180 = vmatpush1.bf16.msra.mxu0 %v3354_v14  ;;  %v3394_v41 = vld [vmem:[#allocation5 + $0x1d4] ss:$8 sps:$4 sm:$0xff]   ;;  %v3396_v42 = vld [vmem:[#allocation5 + $0xd0] ss:$8 sps:$4 sm:$0xff]   ;;  %v3398_v44 = vld [vmem:[#allocation5 + $0xc4] ss:$8 sps:$4 sm:$0xff]  }
  0x96   : > { %1223 = vmatpush1.bf16.msra.mxu1 %v3355_v15  ;;  %1181 = vmatprep.subr.bf16.mxu0 %v3356_v16  ;;  %v3397_v43 = vld [vmem:[#allocation5 + $0x1d0] ss:$8 sps:$4 sm:$0xff]   ;;  %v3400_v45 = vld [vmem:[#allocation5 + $0x1c4] ss:$8 sps:$4 sm:$0xff]   ;;  %v3402_v46 = vld [vmem:[#allocation5 + $0xc0] ss:$8 sps:$4 sm:$0xff]  }
  0x97   : > { %1224 = vmatprep.subr.bf16.mxu1 %v3358_v17  ;;  %v3403_v47 = vld [vmem:[#allocation5 + $0x1c0] ss:$8 sps:$4 sm:$0xff]   ;;  %v3404_v52 = vld [vmem:[#allocation5 + $0xb4] ss:$8 sps:$4 sm:$0xff]   ;;  %v3408_v56 = vld [vmem:[#allocation5 + $0xb0] ss:$8 sps:$4 sm:$0xff]  }
  0x98   : > { %v345_v48 = vld [vmem:[%s4024_s10] sm:$0xff]  ;;  %v346_v50 = vld [vmem:[%s4024_s10 + $0x8] sm:$0xff]  ;;  %v3406_v54 = vld [vmem:[#allocation5 + $0x1b4] ss:$8 sps:$4 sm:$0xff]   ;;  %s4101_s28 = scalar_lea.vmem [#allocation13], %s2874_s13  ;;  %s3203_s18 = sshll.u32 %s3872_s27, 10 }
  0x99   : > { %1182 = vmatpush1.bf16.msra.mxu0 %v3360_v18  ;;  %v349_v49 = vld [vmem:[%s4024_s10 + $0x20] sm:$0xff]  ;;  %v350_v51 = vld [vmem:[%s4024_s10 + $0x28] sm:$0xff]  ;;  %v3409_v57 = vld [vmem:[#allocation5 + $0x1b0] ss:$8 sps:$4 sm:$0xff]   ;;  %s2740_s30 = sshll.u32 %s4101_s28, 4  ;;  %s4120_s17 = scalar_lea.hbm %s4170_s6, %s3203_s18  ;;  %s4113_s30 = int_to_ptr.vmem [resolvable:$true] %s2740_s30 }
  0x9a   : > { %1225 = vmatpush1.bf16.msra.mxu1 %v3361_v19  ;;  %1183 = vmatprep.subr.bf16.mxu0 %v3362_v20  ;;  %v2882_v53 = vcombine.high %v345_v48, %v349_v49  ;;  %v2884_v55 = vcombine.high %v346_v50, %v350_v51  ;;  %v3410_v58 = vld [vmem:[#allocation5 + $0xa4] ss:$8 sps:$4 sm:$0xff]   ;;  %v3414_v60 = vld [vmem:[#allocation5 + $0xa0] ss:$8 sps:$4 sm:$0xff]   ;;  %v3416_v62 = vld [vmem:[#allocation5 + $0x94] ss:$8 sps:$4 sm:$0xff]   ;;  %v2881_v8 = vcombine.low %v345_v48, %v349_v49 }
  0x9b   : > { %1226 = vmatprep.subr.bf16.mxu1 %v3364_v21  ;;  %v3412_v59 = vld [vmem:[#allocation5 + $0x1a4] ss:$8 sps:$4 sm:$0xff]   ;;  %v3415_v61 = vld [vmem:[#allocation5 + $0x1a0] ss:$8 sps:$4 sm:$0xff]   ;;  %v3418_v63 = vld [vmem:[#allocation5 + $0x194] ss:$8 sps:$4 sm:$0xff]   ;;  %v2883_v9 = vcombine.low %v346_v50, %v350_v51 }
  0x9c   : > { %1205 = vmatprep.mubr.bf16.mxu0 %v2882_v53  ;;  %1248 = vmatprep.mubr.bf16.mxu1 %v2884_v55  ;;  %v3420_v0 = vld [vmem:[#allocation5 + $0x90] ss:$8 sps:$4 sm:$0xff]   ;;  %v3422_v2 = vld [vmem:[#allocation5 + $0x84] ss:$8 sps:$4 sm:$0xff]   ;;  %v3426_v4 = vld [vmem:[#allocation5 + $0x80] ss:$8 sps:$4 sm:$0xff]  }
  0x9d   : > { %1184 = vmatpush1.bf16.msra.mxu0 %v3366_v22  ;;  %v3421_v1 = vld [vmem:[#allocation5 + $0x190] ss:$8 sps:$4 sm:$0xff]   ;;  %v3424_v3 = vld [vmem:[#allocation5 + $0x184] ss:$8 sps:$4 sm:$0xff]   ;;  %v3427_v5 = vld [vmem:[#allocation5 + $0x180] ss:$8 sps:$4 sm:$0xff]  }
  0x9e   : > { %1227 = vmatpush1.bf16.msra.mxu1 %v3367_v23  ;;  %1185 = vmatprep.subr.bf16.mxu0 %v3368_v24  ;;  %v3430_v6 = vld [vmem:[#allocation5 + $0x274] ss:$8 sps:$4 sm:$0xff]   ;;  %v3428_v10 = vld [vmem:[#allocation5 + $0x270] ss:$8 sps:$4 sm:$0xff]   ;;  %v3436_v12 = vld [vmem:[#allocation5 + $0x264] ss:$8 sps:$4 sm:$0xff]  }
  0x9f   : > { %1228 = vmatprep.subr.bf16.mxu1 %v3370_v25  ;;  %v3433_v7 = vld [vmem:[#allocation5 + $0x374] ss:$8 sps:$4 sm:$0xff]   ;;  %v3431_v11 = vld [vmem:[#allocation5 + $0x370] ss:$8 sps:$4 sm:$0xff]   ;;  %v3439_v13 = vld [vmem:[#allocation5 + $0x364] ss:$8 sps:$4 sm:$0xff]  }
  0xa0   : > { %v3434_v14 = vld [vmem:[#allocation5 + $0x260] ss:$8 sps:$4 sm:$0xff]   ;;  %v3442_v16 = vld [vmem:[#allocation5 + $0x254] ss:$8 sps:$4 sm:$0xff]   ;;  %v3440_v18 = vld [vmem:[#allocation5 + $0x250] ss:$8 sps:$4 sm:$0xff]  }
  0xa1   : > { %1186 = vmatpush1.bf16.msra.mxu0 %v3372_v26  ;;  %v3437_v15 = vld [vmem:[#allocation5 + $0x360] ss:$8 sps:$4 sm:$0xff]   ;;  %v3445_v17 = vld [vmem:[#allocation5 + $0x354] ss:$8 sps:$4 sm:$0xff]   ;;  %v3443_v19 = vld [vmem:[#allocation5 + $0x350] ss:$8 sps:$4 sm:$0xff]  }
  0xa2   : > { %1229 = vmatpush1.bf16.msra.mxu1 %v3373_v27  ;;  %1187 = vmatprep.subr.bf16.mxu0 %v3374_v28  ;;  %v3448_v20 = vld [vmem:[#allocation5 + $0x244] ss:$8 sps:$4 sm:$0xff]   ;;  %v3446_v22 = vld [vmem:[#allocation5 + $0x240] ss:$8 sps:$4 sm:$0xff]   ;;  %v3454_v24 = vld [vmem:[#allocation5 + $0x234] ss:$8 sps:$4 sm:$0xff]  }
  0xa3   : > { %1230 = vmatprep.subr.bf16.mxu1 %v3376_v29  ;;  %v3451_v21 = vld [vmem:[#allocation5 + $0x344] ss:$8 sps:$4 sm:$0xff]   ;;  %v3449_v23 = vld [vmem:[#allocation5 + $0x340] ss:$8 sps:$4 sm:$0xff]   ;;  %v3457_v25 = vld [vmem:[#allocation5 + $0x334] ss:$8 sps:$4 sm:$0xff]  }
  0xa4   : > { %v3452_v26 = vld [vmem:[#allocation5 + $0x230] ss:$8 sps:$4 sm:$0xff]   ;;  %v3460_v28 = vld [vmem:[#allocation5 + $0x224] ss:$8 sps:$4 sm:$0xff]   ;;  %v3485_v53 = vld [vmem:[#allocation5 + $0x3e0] ss:$8 sps:$4 sm:$0xff]  }
  0xa5   : > { %1188 = vmatpush1.bf16.msra.mxu0 %v3378_v30  ;;  %v3455_v27 = vld [vmem:[#allocation5 + $0x330] ss:$8 sps:$4 sm:$0xff]   ;;  %v3463_v29 = vld [vmem:[#allocation5 + $0x324] ss:$8 sps:$4 sm:$0xff]   ;;  %v3458_v30 = vld [vmem:[#allocation5 + $0x220] ss:$8 sps:$4 sm:$0xff]  }
  0xa6   : > { %1231 = vmatpush1.bf16.msra.mxu1 %v3379_v31  ;;  %1189 = vmatprep.subr.bf16.mxu0 %v3380_v32  ;;  %v3461_v31 = vld [vmem:[#allocation5 + $0x320] ss:$8 sps:$4 sm:$0xff]   ;;  %v3466_v32 = vld [vmem:[#allocation5 + $0x214] ss:$8 sps:$4 sm:$0xff]   ;;  %v3476_v48 = vld [vmem:[#allocation5 + $0x2f0] ss:$8 sps:$4 sm:$0xff]  }
  0xa7   : > { %1232 = vmatprep.subr.bf16.mxu1 %v3382_v33  ;;  %v3469_v33 = vld [vmem:[#allocation5 + $0x314] ss:$8 sps:$4 sm:$0xff]   ;;  %v3479_v49 = vld [vmem:[#allocation5 + $0x3f0] ss:$8 sps:$4 sm:$0xff]   ;;  %v3484_v50 = vld [vmem:[#allocation5 + $0x2e4] ss:$8 sps:$4 sm:$0xff]  }
  0xa8   : > { %v3487_v51 = vld [vmem:[#allocation5 + $0x3e4] ss:$8 sps:$4 sm:$0xff]   ;;  %v3493_v55 = vld [vmem:[#allocation5 + $0x3d4] ss:$8 sps:$4 sm:$0xff]   ;;  %s2726_s27 = scalar_lea.sflag [#allocation4], %s4018_s12  ;;  %s3722_s19 = scalar_lea.vmem %s4113_s30, 1024 }
  0xa9   : > { %1190 = vmatpush2.bf16.msra.mxu0 %v3384_v34  ;;  %v3464_v34 = vld [vmem:[#allocation5 + $0x210] ss:$8 sps:$4 sm:$0xff]   ;;  %p3723_p2 = scmp.ne.s32.totalorder %s4113_s30, %s3722_s19  ;;  %p4194_p4 = scmp.ne.s32.totalorder %s4181_s8, 0 }
  0xaa   : > { %1233 = vmatpush2.bf16.msra.mxu1 %v3385_v35  ;;  %1191 = vmatprep.subr.bf16.mxu0 %v3386_v36  ;;  %v3467_v35 = vld [vmem:[#allocation5 + $0x310] ss:$8 sps:$4 sm:$0xff]   ;;  %s3813_s11 = smov [#allocation13]  }
  0xab   : > { %1234 = vmatprep.subr.bf16.mxu1 %v3388_v37  ;;  %v4047_v36 = vld [vmem:[%s4024_s10 + $0x10] sm:$0xff]  ;;  %v3472_v37 = vld [vmem:[#allocation5 + $0x204] ss:$8 sps:$4 sm:$0xff]   ;;  %p3724_p8 = pnand %p3723_p2, %p4194_p4  ;;  %s3726_s15 = sshll.u32 %s3813_s11, 4  ;;  %s3727_s15 = int_to_ptr.vmem [resolvable:$false] %s3726_s15 }
  0xac   : > { %s3728_s26 = scalar_lea.vmem %s3727_s15, 2048  ;;  %p3729_p6 = scmp.lt.s32.totalorder %s4113_s30, %s3727_s15 }
  0xad   : > { %1192 = vmatpush2.bf16.msra.mxu0 %v3390_v38  ;;  %v4050_v38 = vld [vmem:[%s4024_s10 + $0x30] sm:$0xff]  ;;  %p3725_p9 = pneg %p3724_p8  ;;  %p3730_p13 = scmp.lt.s32.totalorder %s3728_s26, %s3722_s19 }
  0xae   : > { %1235 = vmatpush2.bf16.msra.mxu1 %v3391_v39  ;;  %1193 = vmatprep.subr.bf16.mxu0 %v3392_v40  ;;  %v4053_v39 = vld [vmem:[%s4024_s10 + $0x18] sm:$0xff] }
  0xaf   : > { %1236 = vmatprep.subr.bf16.mxu1 %v3394_v41  ;;  %v4056_v40 = vld [vmem:[%s4024_s10 + $0x38] sm:$0xff]  ;;  %v3475_v41 = vld [vmem:[#allocation5 + $0x304] ss:$8 sps:$4 sm:$0xff]   ;;  %p3731_p1 = por %p3730_p13, %p3729_p6 }
  0xb1   : > { %1194 = vmatpush2.bf16.msra.mxu0 %v3396_v42  ;;  %v2886_v42 = vcombine.high %v4047_v36, %v4050_v38  ;;  %p3732_p3 = pnand %p3731_p1, %p3725_p9 }
  0xb2   : > { %1237 = vmatpush2.bf16.msra.mxu1 %v3397_v43  ;;  %1195 = vmatprep.subr.bf16.mxu0 %v3398_v44  ;;  %v2888_v43 = vcombine.high %v4053_v39, %v4056_v40  ;;  %v3470_v44 = vld [vmem:[#allocation5 + $0x200] ss:$8 sps:$4 sm:$0xff]  }
  0xb3   : > { %1238 = vmatprep.subr.bf16.mxu1 %v3400_v45  ;;  %v3473_v45 = vld [vmem:[#allocation5 + $0x300] ss:$8 sps:$4 sm:$0xff]  }
  0xb5   : > { %1196 = vmatpush2.bf16.msra.mxu0 %v3402_v46  ;;  %v3478_v46 = vld [vmem:[#allocation5 + $0x2f4] ss:$8 sps:$4 sm:$0xff]  }
  0xb6   : > { %1239 = vmatpush2.bf16.msra.mxu1 %v3403_v47  ;;  %1197 = vmatprep.subr.bf16.mxu0 %v3404_v52  ;;  %v3481_v47 = vld [vmem:[#allocation5 + $0x3f4] ss:$8 sps:$4 sm:$0xff]   ;;  %v3482_v52 = vld [vmem:[#allocation5 + $0x2e0] ss:$8 sps:$4 sm:$0xff]  }
  0xb7   : > { %1240 = vmatprep.subr.bf16.mxu1 %v3406_v54  ;;  %v3490_v54 = vld [vmem:[#allocation5 + $0x2d4] ss:$8 sps:$4 sm:$0xff]  }
  0xb9   : > { %1198 = vmatpush2.bf16.msra.mxu0 %v3408_v56  ;;  %v3488_v56 = vld [vmem:[#allocation5 + $0x2d0] ss:$8 sps:$4 sm:$0xff]  }
  0xba   : > { %1241 = vmatpush2.bf16.msra.mxu1 %v3409_v57  ;;  %1199 = vmatprep.subr.bf16.mxu0 %v3410_v58  ;;  %v3491_v57 = vld [vmem:[#allocation5 + $0x3d0] ss:$8 sps:$4 sm:$0xff]   ;;  %v3496_v58 = vld [vmem:[#allocation5 + $0x2c4] ss:$8 sps:$4 sm:$0xff]  }
  0xbb   : > { %1242 = vmatprep.subr.bf16.mxu1 %v3412_v59  ;;  %v3499_v59 = vld [vmem:[#allocation5 + $0x3c4] ss:$8 sps:$4 sm:$0xff]  }
  0xbd   : > { %1200 = vmatpush2.bf16.msra.mxu0 %v3414_v60  ;;  %v3494_v60 = vld [vmem:[#allocation5 + $0x2c0] ss:$8 sps:$4 sm:$0xff]  }
  0xbe   : > { %1243 = vmatpush2.bf16.msra.mxu1 %v3415_v61  ;;  %1201 = vmatprep.subr.bf16.mxu0 %v3416_v62  ;;  %v3497_v61 = vld [vmem:[#allocation5 + $0x3c0] ss:$8 sps:$4 sm:$0xff]   ;;  %v3502_v62 = vld [vmem:[#allocation5 + $0x2b4] ss:$8 sps:$4 sm:$0xff]  }
  0xbf   : > { %1244 = vmatprep.subr.bf16.mxu1 %v3418_v63  ;;  %v3505_v63 = vld [vmem:[#allocation5 + $0x3b4] ss:$8 sps:$4 sm:$0xff]  }
  0xc1   : > { %1202 = vmatpush2.bf16.msra.mxu0 %v3420_v0  ;;  %v3500_v0 = vld [vmem:[#allocation5 + $0x2b0] ss:$8 sps:$4 sm:$0xff]  }
  0xc2   : > { %1245 = vmatpush2.bf16.msra.mxu1 %v3421_v1  ;;  %1203 = vmatprep.subr.bf16.mxu0 %v3422_v2  ;;  %v3503_v1 = vld [vmem:[#allocation5 + $0x3b0] ss:$8 sps:$4 sm:$0xff]   ;;  %v3508_v2 = vld [vmem:[#allocation5 + $0x2a4] ss:$8 sps:$4 sm:$0xff]  }
  0xc3   : > { %1246 = vmatprep.subr.bf16.mxu1 %v3424_v3  ;;  %v3511_v3 = vld [vmem:[#allocation5 + $0x3a4] ss:$8 sps:$4 sm:$0xff]  }
  0xc5   : > { %1204 = vmatpush2.bf16.msra.mxu0 %v3426_v4  ;;  %v3506_v4 = vld [vmem:[#allocation5 + $0x2a0] ss:$8 sps:$4 sm:$0xff]  }
  0xc6   : > { %1247 = vmatpush2.bf16.msra.mxu1 %v3427_v5  ;;  %1259 = vmatprep.subr.bf16.mxu0 %v3430_v6  ;;  %v3509_v5 = vld [vmem:[#allocation5 + $0x3a0] ss:$8 sps:$4 sm:$0xff]   ;;  %v3514_v6 = vld [vmem:[#allocation5 + $0x294] ss:$8 sps:$4 sm:$0xff]  }
  0xc7   : > { %1302 = vmatprep.subr.bf16.mxu1 %v3433_v7  ;;  %v3517_v7 = vld [vmem:[#allocation5 + $0x394] ss:$8 sps:$4 sm:$0xff]  }
  0xc8   : > { %1206 = vmatmul.mubr.bf16.vlgmr.msra.gmra.mxu0 %v2881_v8  ;;  %v3512_v8 = vld [vmem:[#allocation5 + $0x290] ss:$8 sps:$4 sm:$0xff]  }
  0xc9   : > { %1249 = vmatmul.mubr.bf16.vlgmr.msra.gmra.mxu1 %v2883_v9  ;;  %1260 = vmatpush1.bf16.msra.mxu0 %v3428_v10  ;;  %v3515_v9 = vld [vmem:[#allocation5 + $0x390] ss:$8 sps:$4 sm:$0xff]   ;;  %v3520_v10 = vld [vmem:[#allocation5 + $0x284] ss:$8 sps:$4 sm:$0xff]  }
  0xca   : > { %1303 = vmatpush1.bf16.msra.mxu1 %v3431_v11  ;;  %1261 = vmatprep.subr.bf16.mxu0 %v3436_v12  ;;  %v3523_v11 = vld [vmem:[#allocation5 + $0x384] ss:$8 sps:$4 sm:$0xff]   ;;  %v3518_v12 = vld [vmem:[#allocation5 + $0x280] ss:$8 sps:$4 sm:$0xff]  }
  0xcb   : > { %1304 = vmatprep.subr.bf16.mxu1 %v3439_v13  ;;  %1291 = vmatprep.mubr.bf16.mxu0 %v2886_v42  ;;  %v3521_v13 = vld [vmem:[#allocation5 + $0x380] ss:$8 sps:$4 sm:$0xff]   ;;  %v483_v42 = vlaneseq }
  0xcc   : > { %1334 = vmatprep.mubr.bf16.mxu1 %v2888_v43 }
  0xcd   : > { %1262 = vmatpush1.bf16.msra.mxu0 %v3434_v14  ;;  %v2885_v14 = vcombine.low %v4047_v36, %v4050_v38  ;;  %v3548_v36 = vld [vmem:[#allocation8 + $0x54] ss:$8 sps:$4 sm:$0xff]   ;;  %v3551_v38 = vld [vmem:[#allocation8 + $0x44] ss:$8 sps:$4 sm:$0xff]   ;;  %v4066_v43 = vshrl.u32 %v483_v42, 7 }
  0xce   : > { %1305 = vmatpush1.bf16.msra.mxu1 %v3437_v15  ;;  %1263 = vmatprep.subr.bf16.mxu0 %v3442_v16  ;;  %v2887_v15 = vcombine.low %v4053_v39, %v4056_v40  ;;  %v3524_v16 = vld [vmem:[#allocation7 + $0x78] sm:$0xff]   ;;  %v3549_v39 = vld [vmem:[#allocation8 + $0x40] ss:$8 sps:$4 sm:$0xff]  }
  0xcf   : > { %1306 = vmatprep.subr.bf16.mxu1 %v3445_v17  ;;  %v3525_v17 = vld [vmem:[#allocation7 + $0x38] sm:$0xff]   ;;  %v1727_v42 = vld [vmem:[#allocation10 + $0x140] sm:$0xff] }
  0xd0   : > { %v3554_v40 = vld [vmem:[#allocation8 + $0x34] ss:$8 sps:$4 sm:$0xff]  }
  0xd1   : > { %1264 = vmatpush1.bf16.msra.mxu0 %v3440_v18  ;;  %v3526_v18 = vld [vmem:[#allocation7 + $0x70] sm:$0xff]  }
  0xd2   : > { %1307 = vmatpush1.bf16.msra.mxu1 %v3443_v19  ;;  %1265 = vmatprep.subr.bf16.mxu0 %v3448_v20  ;;  %v3527_v19 = vld [vmem:[#allocation7 + $0x30] sm:$0xff]   ;;  %v3528_v20 = vld [vmem:[#allocation7 + $0x68] sm:$0xff]  }
  0xd3   : > { %1308 = vmatprep.subr.bf16.mxu1 %v3451_v21  ;;  %v3529_v21 = vld [vmem:[#allocation7 + $0x28] sm:$0xff]  }
  0xd5   : > { %1266 = vmatpush1.bf16.msra.mxu0 %v3446_v22  ;;  %v3530_v22 = vld [vmem:[#allocation7 + $0x60] sm:$0xff]  }
  0xd6   : > { %1309 = vmatpush1.bf16.msra.mxu1 %v3449_v23  ;;  %1267 = vmatprep.subr.bf16.mxu0 %v3454_v24  ;;  %v3531_v23 = vld [vmem:[#allocation7 + $0x20] sm:$0xff]   ;;  %v3532_v24 = vld [vmem:[#allocation7 + $0x58] sm:$0xff]  }
  0xd7   : > { %1310 = vmatprep.subr.bf16.mxu1 %v3457_v25  ;;  %v3533_v25 = vld [vmem:[#allocation7 + $0x18] sm:$0xff]  }
  0xd9   : > { %1268 = vmatpush1.bf16.msra.mxu0 %v3452_v26  ;;  %v3534_v26 = vld [vmem:[#allocation7 + $0x50] sm:$0xff]  }
  0xda   : > { %1311 = vmatpush1.bf16.msra.mxu1 %v3455_v27  ;;  %1269 = vmatprep.subr.bf16.mxu0 %v3460_v28  ;;  %v3535_v27 = vld [vmem:[#allocation7 + $0x10] sm:$0xff]   ;;  %v3536_v28 = vld [vmem:[#allocation7 + $0x48] sm:$0xff]  }
  0xdb   : > { %1312 = vmatprep.subr.bf16.mxu1 %v3463_v29  ;;  %v3537_v29 = vld [vmem:[#allocation7 + $0x8] sm:$0xff]  }
  0xdd   : > { %1270 = vmatpush1.bf16.msra.mxu0 %v3458_v30  ;;  %v3538_v30 = vld [vmem:[#allocation7 + $0x40] sm:$0xff]  }
  0xde   : > { %1313 = vmatpush1.bf16.msra.mxu1 %v3461_v31  ;;  %1271 = vmatprep.subr.bf16.mxu0 %v3466_v32  ;;  %v3539_v31 = vld [vmem:[#allocation7] sm:$0xff]   ;;  %v3540_v32 = vld [vmem:[#allocation8 + $0x70] ss:$8 sps:$4 sm:$0xff]  }
  0xdf   : > { %1314 = vmatprep.subr.bf16.mxu1 %v3469_v33  ;;  %v3542_v33 = vld [vmem:[#allocation8 + $0x74] ss:$8 sps:$4 sm:$0xff]  }
  0xe1   : > { %1272 = vmatpush1.bf16.msra.mxu0 %v3464_v34  ;;  %v3545_v34 = vld [vmem:[#allocation8 + $0x64] ss:$8 sps:$4 sm:$0xff]  }
  0xe2   : > { %1315 = vmatpush1.bf16.msra.mxu1 %v3467_v35  ;;  %1273 = vmatprep.subr.bf16.mxu0 %v3472_v37  ;;  %v3543_v35 = vld [vmem:[#allocation8 + $0x60] ss:$8 sps:$4 sm:$0xff]   ;;  %v3546_v37 = vld [vmem:[#allocation8 + $0x50] ss:$8 sps:$4 sm:$0xff]  }
  0xe3   : > { %1316 = vmatprep.subr.bf16.mxu1 %v3475_v41  ;;  %v3552_v41 = vld [vmem:[#allocation8 + $0x30] ss:$8 sps:$4 sm:$0xff]  }
  0xe5   : > { %1274 = vmatpush1.bf16.msra.mxu0 %v3470_v44 }
  0xe6   : > { %1317 = vmatpush1.bf16.msra.mxu1 %v3473_v45  ;;  %1275 = vmatprep.subr.bf16.mxu0 %v3478_v46  ;;  %v4069_v46 = vsub.s32 1, %v4066_v43 }
  0xe7   : > { %1318 = vmatprep.subr.bf16.mxu1 %v3481_v47  ;;  %v481_v47 = vld [vmem:[#allocation11] sm:$0x3] }
  0xe9   : > { %1276 = vmatpush2.bf16.msra.mxu0 %v3476_v48  ;;  %v4072_v48 = vsub.s32 0, %v4066_v43 }
  0xea   : > { %1319 = vmatpush2.bf16.msra.mxu1 %v3479_v49  ;;  %1277 = vmatprep.subr.bf16.mxu0 %v3484_v50 }
  0xeb   : > { %1320 = vmatprep.subr.bf16.mxu1 %v3487_v51  ;;  %v490_v51 = vrot.slane %v481_v47, %v4069_v46 }
  0xed   : > { %1278 = vmatpush2.bf16.msra.mxu0 %v3482_v52  ;;  %v486_v52 = vrot.slane %v481_v47, %v4072_v48 }
  0xee   : > { %1321 = vmatpush2.bf16.msra.mxu1 %v3485_v53  ;;  %1279 = vmatprep.subr.bf16.mxu0 %v3490_v54 }
  0xef   : > { %1322 = vmatprep.subr.bf16.mxu1 %v3493_v55 }
  0xf1   : > { %1280 = vmatpush2.bf16.msra.mxu0 %v3488_v56 }
  0xf2   : > { %1323 = vmatpush2.bf16.msra.mxu1 %v3491_v57  ;;  %1281 = vmatprep.subr.bf16.mxu0 %v3496_v58 }
  0xf3   : > { %1324 = vmatprep.subr.bf16.mxu1 %v3499_v59 }
  0xf5   : > { %1282 = vmatpush2.bf16.msra.mxu0 %v3494_v60 }
  0xf6   : > { %1325 = vmatpush2.bf16.msra.mxu1 %v3497_v61  ;;  %1283 = vmatprep.subr.bf16.mxu0 %v3502_v62 }
  0xf7   : > { %1326 = vmatprep.subr.bf16.mxu1 %v3505_v63 }
  0xf9   : > { %1284 = vmatpush2.bf16.msra.mxu0 %v3500_v0 }
  0xfa   : > { %1327 = vmatpush2.bf16.msra.mxu1 %v3503_v1  ;;  %1285 = vmatprep.subr.bf16.mxu0 %v3508_v2 }
  0xfb   : > { %1328 = vmatprep.subr.bf16.mxu1 %v3511_v3 }
  0xfd   : > { %1286 = vmatpush2.bf16.msra.mxu0 %v3506_v4 }
  0xfe   : > { %1329 = vmatpush2.bf16.msra.mxu1 %v3509_v5  ;;  %1287 = vmatprep.subr.bf16.mxu0 %v3514_v6 }
  0xff   : > { %1330 = vmatprep.subr.bf16.mxu1 %v3517_v7 }
 0x101   : > { %1288 = vmatpush2.bf16.msra.mxu0 %v3512_v8 }
 0x102   : > { %1331 = vmatpush2.bf16.msra.mxu1 %v3515_v9  ;;  %1289 = vmatprep.subr.bf16.mxu0 %v3520_v10 }
 0x103   : > { %1332 = vmatprep.subr.bf16.mxu1 %v3523_v11 }
 0x105   : > { %1290 = vmatpush2.bf16.msra.mxu0 %v3518_v12 }
 0x106   : > { %1333 = vmatpush2.bf16.msra.mxu1 %v3521_v13  ;;  %3204 = vmatprep.subr.bf16.mxu0 %v3524_v16 }
 0x107   : > { %1638 = vmatprep.subr.bf16.mxu1 %v3542_v33 }
 0x108   : > { %1292 = vmatmul.mubr.bf16.vlgmr.msra.gmra.mxu0 %v2885_v14 }
 0x109   : > { %1335 = vmatmul.mubr.bf16.vlgmr.msra.gmra.mxu1 %v2887_v15  ;;  %3205 = vmatpush3.bf16.msra.mxu0 %v3525_v17 }
 0x10a   : > { %3206 = vmatprep.subr.bf16.mxu0 %v3526_v18  ;;  %1639 = vmatpush1.bf16.msra.mxu1 %v3540_v32  ;;  %v4076_v32 = vld [vmem:[#allocation10 + $0x1c8] sm:$0xff] }
 0x10b   : > { %1640 = vmatprep.subr.bf16.mxu1 %v3545_v34 }
 0x10d   : > { %3207 = vmatpush3.bf16.msra.mxu0 %v3527_v19 }
 0x10e   : > { %3208 = vmatprep.subr.bf16.mxu0 %v3528_v20  ;;  %1641 = vmatpush1.bf16.msra.mxu1 %v3543_v35  ;;  %v4078_v35 = vld [vmem:[#allocation10 + $0x1e8] sm:$0xff] }
 0x10f   : > { %1642 = vmatprep.subr.bf16.mxu1 %v3548_v36  ;;  %v1735_v36 = vld [vmem:[#allocation10 + $0x180] sm:$0xff] }
 0x111   : > { %3209 = vmatpush3.bf16.msra.mxu0 %v3529_v21 }
 0x112   : > { %3210 = vmatprep.subr.bf16.mxu0 %v3530_v22  ;;  %1643 = vmatpush1.bf16.msra.mxu1 %v3546_v37  ;;  %v1739_v37 = vld [vmem:[#allocation10 + $0x1a0] sm:$0xff] }
 0x113   : > { %1644 = vmatprep.subr.bf16.mxu1 %v3551_v38  ;;  %v3108_v38 = vcombine.low %v4076_v32, %v4078_v35 }
 0x115   : > { %3211 = vmatpush3.bf16.msra.mxu0 %v3531_v23  ;;  %v3557_v23 = vld [vmem:[#allocation8 + $0x24] ss:$8 sps:$4 sm:$0xff]  }
 0x116   : > { %3212 = vmatprep.subr.bf16.mxu0 %v3532_v24  ;;  %1645 = vmatpush1.bf16.msra.mxu1 %v3549_v39  ;;  %v3555_v24 = vld [vmem:[#allocation8 + $0x20] ss:$8 sps:$4 sm:$0xff]   ;;  %v3109_v39 = vcombine.high %v4076_v32, %v4078_v35 }
 0x117   : > { %1646 = vmatprep.subr.bf16.mxu1 %v3554_v40  ;;  %v3099_v40 = vcombine.high %v1735_v36, %v1739_v37 }
 0x119   : > { %3213 = vmatpush3.bf16.msra.mxu0 %v3533_v25  ;;  %v3560_v25 = vld [vmem:[#allocation8 + $0x14] ss:$8 sps:$4 sm:$0xff]  }
 0x11a   : > { %3214 = vmatprep.subr.bf16.mxu0 %v3534_v26  ;;  %1647 = vmatpush1.bf16.msra.mxu1 %v3552_v41  ;;  %v3558_v26 = vld [vmem:[#allocation8 + $0x10] ss:$8 sps:$4 sm:$0xff]   ;;  %v3098_v41 = vcombine.low %v1735_v36, %v1739_v37  ;;  %v1736_v36 = vld [vmem:[#allocation10 + $0x188] sm:$0xff] }
 0x11b   : > { %1648 = vmatprep.subr.bf16.mxu1 %v3557_v23  ;;  %v1740_v37 = vld [vmem:[#allocation10 + $0x1a8] sm:$0xff] }
 0x11d   : > { %3215 = vmatpush3.bf16.msra.mxu0 %v3535_v27  ;;  %v3563_v27 = vld [vmem:[#allocation8 + $0x4] ss:$8 sps:$4 sm:$0xff]  }
 0x11e   : > { %3216 = vmatprep.subr.bf16.mxu0 %v3536_v28  ;;  %1649 = vmatpush1.bf16.msra.mxu1 %v3555_v24  ;;  %v3561_v28 = vld [vmem:[#allocation8] ss:$8 sps:$4 sm:$0xff]  }
 0x11f   : > { %1650 = vmatprep.subr.bf16.mxu1 %v3560_v25 }
 0x121   : > { %3217 = vmatpush3.bf16.msra.mxu0 %v3537_v29  ;;  %v3812_v29 = vmov 0  }
 0x122   : > { %3218 = vmatprep.subr.bf16.mxu0 %v3538_v30  ;;  %1651 = vmatpush1.bf16.msra.mxu1 %v3558_v26  ;;  %v1743_v30 = vld [vmem:[#allocation10 + $0x1c0] sm:$0xff] }
 0x123   : > { %1652 = vmatprep.subr.bf16.mxu1 %v3563_v27  ;;  %1670 = vmatprep.mubr.bf16.mxu1 %v3812_v29 }
 0x125   : > { %3219 = vmatpush3.bf16.msra.mxu0 %v3539_v31  ;;  %v1747_v31 = vld [vmem:[#allocation10 + $0x1e0] sm:$0xff] }
 0x126   : > { %1653 = vmatpush1.bf16.msra.mxu1 %v3561_v28  ;;  %v3106_v33 = vcombine.low %v1743_v30, %v1747_v31  ;;  %v3107_v34 = vcombine.high %v1743_v30, %v1747_v31  ;;  %v3017_v28 = vld [vmem:[#allocation11 + $0x2] ss:$0 sm:$0xff] }
 0x127   : > { %2540 = vmatprep.subr.bf16.mxu1 %v3109_v39 }
 0x128   : > { %2497 = vmatprep.subr.bf16.mxu0 %v3107_v34 }
 0x188   : > { %v1207_v44 = vpop.f32.mrf.mxu0 }
 0x189   : > { %v1250_v45 = vpop.f32.mrf.mxu1  ;;  %v1208_v56 = vadd.f32 %v1207_v44, %v486_v52  ;;  %v1731_v44 = vld [vmem:[#allocation10 + $0x160] sm:$0xff] }
 0x18a   : > { %v1209_v49 = vpop.f32.mrf.mxu0  ;;  %v3090_v47 = vcombine.low %v1727_v42, %v1731_v44 }
 0x18b   : > { %v1252_v50 = vpop.f32.mrf.mxu1  ;;  %v1210_v55 = vadd.f32 %v1209_v49, %v490_v51  ;;  %v1251_v0 = vadd.f32 %v1250_v45, %v1208_v56  ;;  %v3091_v45 = vcombine.high %v1727_v42, %v1731_v44  ;;  %v1719_v49 = vld [vmem:[#allocation10 + $0x100] sm:$0xff]  ;;  %v3101_v42 = vcombine.high %v1736_v36, %v1740_v37  ;;  %v1728_v44 = vld [vmem:[#allocation10 + $0x148] sm:$0xff] }
 0x18c   : > { %v1211_v53 = vpop.f32.mrf.mxu0 }
 0x18d   : > { %v1254_v54 = vpop.f32.mrf.mxu1  ;;  %v1212_v59 = vadd.f32 %v1211_v53, %v486_v52  ;;  %v1253_v62 = vadd.f32 %v1252_v50, %v1210_v55  ;;  %v1723_v50 = vld [vmem:[#allocation10 + $0x120] sm:$0xff] }
 0x18e   : > { %v1213_v57 = vpop.f32.mrf.mxu0  ;;  %v3082_v52 = vcombine.low %v1719_v49, %v1723_v50  ;;  %v1711_v53 = vld [vmem:[#allocation10 + $0xc0] sm:$0xff] }
 0x18f   : > { %v1256_v58 = vpop.f32.mrf.mxu1  ;;  %v1214_v63 = vadd.f32 %v1213_v57, %v490_v51  ;;  %v1255_v3 = vadd.f32 %v1254_v54, %v1212_v59  ;;  %v3083_v51 = vcombine.high %v1719_v49, %v1723_v50  ;;  %v1715_v54 = vld [vmem:[#allocation10 + $0xe0] sm:$0xff]  ;;  %v1720_v50 = vld [vmem:[#allocation10 + $0x108] sm:$0xff] }
 0x190   : > { %v3075_v55 = vcombine.high %v1711_v53, %v1715_v54  ;;  %v3074_v56 = vcombine.low %v1711_v53, %v1715_v54  ;;  %v1703_v57 = vld [vmem:[#allocation10 + $0x80] sm:$0xff]  ;;  %v1712_v54 = vld [vmem:[#allocation10 + $0xc8] sm:$0xff] }
 0x191   : > { %v1257_v8 = vadd.f32 %v1256_v58, %v1214_v63  ;;  %v1707_v58 = vld [vmem:[#allocation10 + $0xa0] sm:$0xff] }
 0x192   : > { %v3067_v59 = vcombine.high %v1703_v57, %v1707_v58 }
 0x1c8   : > { %v1293_v60 = vpop.f32.mrf.mxu0 }
 0x1c9   : > { %v1336_v61 = vpop.f32.mrf.mxu1  ;;  %v1294_v5 = vadd.f32 %v1293_v60, %v1251_v0  ;;  %v3066_v60 = vcombine.low %v1703_v57, %v1707_v58  ;;  %v1704_v58 = vld [vmem:[#allocation10 + $0x88] sm:$0xff] }
 0x1ca   : > { %v1295_v1 = vpop.f32.mrf.mxu0 }
 0x1cb   : > { %v1338_v2 = vpop.f32.mrf.mxu1  ;;  %v1296_v4 = vadd.f32 %v1295_v1, %v1253_v62  ;;  %v1337_v14 = vadd.f32 %v1336_v61, %v1294_v5  ;;  %v1695_v61 = vld [vmem:[#allocation10 + $0x40] sm:$0xff] }
 0x1cc   : > { %v1297_v6 = vpop.f32.mrf.mxu0  ;;  %v1699_v62 = vld [vmem:[#allocation10 + $0x60] sm:$0xff] }
 0x1cd   : > { %v1340_v7 = vpop.f32.mrf.mxu1  ;;  %v1298_v9 = vadd.f32 %v1297_v6, %v1255_v3  ;;  %v1339_v11 = vadd.f32 %v1338_v2, %v1296_v4  ;;  %v1345_v20 = vmax.f32 %v1337_v14, 0.0  ;;  %v3059_v63 = vcombine.high %v1695_v61, %v1699_v62  ;;  %v1687_v1 = vld [vmem:[#allocation10] sm:$0xff] }
 0x1ce   : > { %v1299_v10 = vpop.f32.mrf.mxu0  ;;  %v3058_v0 = vcombine.low %v1695_v61, %v1699_v62  ;;  %v1691_v2 = vld [vmem:[#allocation10 + $0x20] sm:$0xff] }
 0x1cf   : > { %v1341_v12 = vadd.f32 %v1340_v7, %v1298_v9  ;;  %v1300_v13 = vadd.f32 %v1299_v10, %v1257_v8  ;;  %v1342_v15 = vpop.f32.mrf.mxu1  ;;  %v1346_v18 = vmax.f32 %v1339_v11, 0.0  ;;  %v3051_v3 = vcombine.high %v1687_v1, %v1691_v2  ;;  %v1807_v5 = vld [vmem:[#allocation10 + $0x3c0] sm:$0xff] }
 0x1d0   : > { %v3050_v4 = vcombine.low %v1687_v1, %v1691_v2  ;;  %v1811_v6 = vld [vmem:[#allocation10 + $0x3e0] sm:$0xff] }
 0x1d1   : > { %v1343_v16 = vadd.f32 %v1342_v15, %v1300_v13  ;;  %v1347_v17 = vmax.f32 %v1341_v12, 0.0  ;;  %v3171_v7 = vcombine.high %v1807_v5, %v1811_v6  ;;  %v3170_v8 = vcombine.low %v1807_v5, %v1811_v6  ;;  %v1799_v9 = vld [vmem:[#allocation10 + $0x380] sm:$0xff] }
 0x1d2   : > { %v1803_v10 = vld [vmem:[#allocation10 + $0x3a0] sm:$0xff] }
 0x1d3   : > { %v1348_v19 = vmax.f32 %v1343_v16, 0.0  ;;  %v1349_v22 = vpack.c.bf16 %v1347_v17, %v1345_v20  ;;  %v3163_v11 = vcombine.high %v1799_v9, %v1803_v10  ;;  %v3162_v12 = vcombine.low %v1799_v9, %v1803_v10  ;;  %v1791_v13 = vld [vmem:[#allocation10 + $0x340] sm:$0xff] }
 0x1d4   : > { %v1795_v14 = vld [vmem:[#allocation10 + $0x360] sm:$0xff] }
 0x1d5   : > { %v1350_v21 = vpack.c.bf16 %v1348_v19, %v1346_v18  ;;  %v3155_v15 = vcombine.high %v1791_v13, %v1795_v14  ;;  %v3154_v16 = vcombine.low %v1791_v13, %v1795_v14  ;;  %v1783_v17 = vld [vmem:[#allocation10 + $0x300] sm:$0xff] }
 0x1d6   : > { %v1787_v18 = vld [vmem:[#allocation10 + $0x320] sm:$0xff] }
 0x1d7   : > { %1518 = vmatprep.mubr.bf16.mxu0 %v1350_v21  ;;  %v3147_v19 = vcombine.high %v1783_v17, %v1787_v18  ;;  %v3146_v20 = vcombine.low %v1783_v17, %v1787_v18  ;;  %v1775_v21 = vld [vmem:[#allocation10 + $0x2c0] sm:$0xff] }
 0x1d8   : > { %1519 = vmatmul.mubr.bf16.vlgmr.msra.gmra.mxu0 %v1349_v22  ;;  %v1779_v22 = vld [vmem:[#allocation10 + $0x2e0] sm:$0xff] }
 0x1d9   : > { %2498 = vmatpush1.bf16.msra.mxu0 %v3106_v33  ;;  %v3139_v23 = vcombine.high %v1775_v21, %v1779_v22  ;;  %v3138_v24 = vcombine.low %v1775_v21, %v1779_v22 }
 0x1da   : > { %2499 = vmatprep.subr.bf16.mxu0 %v3099_v40 }
 0x1dd   : > { %2500 = vmatpush1.bf16.msra.mxu0 %v3098_v41 }
 0x1de   : > { %2501 = vmatprep.subr.bf16.mxu0 %v3091_v45  ;;  %v1732_v45 = vld [vmem:[#allocation10 + $0x168] sm:$0xff] }
 0x1df   : > { %v3093_v49 = vcombine.high %v1728_v44, %v1732_v45 }
 0x1e1   : > { %2502 = vmatpush1.bf16.msra.mxu0 %v3090_v47  ;;  %v3100_v47 = vcombine.low %v1736_v36, %v1740_v37  ;;  %v1760_v36 = vld [vmem:[#allocation10 + $0x248] sm:$0xff] }
 0x1e2   : > { %2503 = vmatprep.subr.bf16.mxu0 %v3083_v51  ;;  %v1724_v51 = vld [vmem:[#allocation10 + $0x128] sm:$0xff] }
 0x1e3   : > { %v3085_v53 = vcombine.high %v1720_v50, %v1724_v51 }
 0x1e5   : > { %2504 = vmatpush1.bf16.msra.mxu0 %v3082_v52  ;;  %v3092_v52 = vcombine.low %v1728_v44, %v1732_v45  ;;  %v1751_v44 = vld [vmem:[#allocation10 + $0x200] sm:$0xff] }
 0x1e6   : > { %2505 = vmatprep.subr.bf16.mxu0 %v3075_v55  ;;  %v1716_v55 = vld [vmem:[#allocation10 + $0xe8] sm:$0xff]  ;;  %v1755_v45 = vld [vmem:[#allocation10 + $0x220] sm:$0xff] }
 0x1e7   : > { %v3077_v57 = vcombine.high %v1712_v54, %v1716_v55  ;;  %v3076_v32 = vcombine.low %v1712_v54, %v1716_v55  ;;  %v1745_v54 = vld [vmem:[#allocation10 + $0x1d0] sm:$0xff] }
 0x1e8   : > { %v1749_v55 = vld [vmem:[#allocation10 + $0x1f0] sm:$0xff] }
 0x1e9   : > { %2506 = vmatpush1.bf16.msra.mxu0 %v3074_v56  ;;  %v3084_v56 = vcombine.low %v1720_v50, %v1724_v51  ;;  %v1756_v50 = vld [vmem:[#allocation10 + $0x228] sm:$0xff]  ;;  %v3114_v51 = vcombine.low %v1751_v44, %v1755_v45 }
 0x1ea   : > { %2507 = vmatprep.subr.bf16.mxu0 %v3067_v59  ;;  %v1708_v59 = vld [vmem:[#allocation10 + $0xa8] sm:$0xff] }
 0x1eb   : > { %v3069_v35 = vcombine.high %v1704_v58, %v1708_v59  ;;  %v3068_v61 = vcombine.low %v1704_v58, %v1708_v59  ;;  %v1750_v58 = vld [vmem:[#allocation10 + $0x1f8] sm:$0xff]  ;;  %v3110_v59 = vcombine.low %v1745_v54, %v1749_v55 }
 0x1ed   : > { %2508 = vmatpush1.bf16.msra.mxu0 %v3066_v60  ;;  %v1700_v60 = vld [vmem:[#allocation10 + $0x68] sm:$0xff] }
 0x1ee   : > { %2509 = vmatprep.subr.bf16.mxu0 %v3059_v63  ;;  %v1688_v63 = vld [vmem:[#allocation10 + $0x8] sm:$0xff] }
 0x1f1   : > { %2510 = vmatpush1.bf16.msra.mxu0 %v3058_v0  ;;  %v1692_v0 = vld [vmem:[#allocation10 + $0x28] sm:$0xff] }
 0x1f2   : > { %2511 = vmatprep.subr.bf16.mxu0 %v3051_v3  ;;  %v3053_v2 = vcombine.high %v1688_v63, %v1692_v0  ;;  %v1808_v3 = vld [vmem:[#allocation10 + $0x3c8] sm:$0xff]  ;;  %v3052_v5 = vcombine.low %v1688_v63, %v1692_v0 }
 0x1f5   : > { %2512 = vmatpush1.bf16.msra.mxu0 %v3050_v4  ;;  %v1812_v4 = vld [vmem:[#allocation10 + $0x3e8] sm:$0xff] }
 0x1f6   : > { %2513 = vmatprep.subr.bf16.mxu0 %v3171_v7  ;;  %v3173_v6 = vcombine.high %v1808_v3, %v1812_v4  ;;  %v1800_v7 = vld [vmem:[#allocation10 + $0x388] sm:$0xff]  ;;  %v3172_v9 = vcombine.low %v1808_v3, %v1812_v4 }
 0x1f9   : > { %2514 = vmatpush2.bf16.msra.mxu0 %v3170_v8  ;;  %v1804_v8 = vld [vmem:[#allocation10 + $0x3a8] sm:$0xff] }
 0x1fa   : > { %2515 = vmatprep.subr.bf16.mxu0 %v3163_v11  ;;  %v3165_v10 = vcombine.high %v1800_v7, %v1804_v8  ;;  %v1792_v11 = vld [vmem:[#allocation10 + $0x348] sm:$0xff]  ;;  %v3164_v13 = vcombine.low %v1800_v7, %v1804_v8 }
 0x1fd   : > { %2516 = vmatpush2.bf16.msra.mxu0 %v3162_v12  ;;  %v1796_v12 = vld [vmem:[#allocation10 + $0x368] sm:$0xff] }
 0x1fe   : > { %2517 = vmatprep.subr.bf16.mxu0 %v3155_v15  ;;  %v3157_v14 = vcombine.high %v1792_v11, %v1796_v12  ;;  %v1784_v15 = vld [vmem:[#allocation10 + $0x308] sm:$0xff]  ;;  %v3156_v17 = vcombine.low %v1792_v11, %v1796_v12  ;;  %v1741_v11 = vld [vmem:[#allocation10 + $0x1b0] sm:$0xff]  ;;  %v1738_v12 = vld [vmem:[#allocation10 + $0x198] sm:$0xff] }
 0x201   : > { %2518 = vmatpush2.bf16.msra.mxu0 %v3154_v16  ;;  %v1788_v16 = vld [vmem:[#allocation10 + $0x328] sm:$0xff] }
 0x202   : > { %2519 = vmatprep.subr.bf16.mxu0 %v3147_v19  ;;  %v3149_v18 = vcombine.high %v1784_v15, %v1788_v16  ;;  %v1776_v19 = vld [vmem:[#allocation10 + $0x2c8] sm:$0xff]  ;;  %v3148_v21 = vcombine.low %v1784_v15, %v1788_v16  ;;  %v1729_v16 = vld [vmem:[#allocation10 + $0x150] sm:$0xff] }
 0x205   : > { %2520 = vmatpush2.bf16.msra.mxu0 %v3146_v20  ;;  %v1780_v20 = vld [vmem:[#allocation10 + $0x2e8] sm:$0xff] }
 0x206   : > { %2521 = vmatprep.subr.bf16.mxu0 %v3139_v23  ;;  %v3141_v22 = vcombine.high %v1776_v19, %v1780_v20  ;;  %v3140_v23 = vcombine.low %v1776_v19, %v1780_v20  ;;  %v1733_v19 = vld [vmem:[#allocation10 + $0x170] sm:$0xff]  ;;  %v1730_v20 = vld [vmem:[#allocation10 + $0x158] sm:$0xff] }
 0x209   : > { %2522 = vmatpush2.bf16.msra.mxu0 %v3138_v24  ;;  %v1767_v24 = vld [vmem:[#allocation10 + $0x280] sm:$0xff] }
 0x298   : > { %v3220_v25 = vpop.f32.mrf.mxu0 }
 0x29a   : > { %v3221_v26 = vpop.f32.mrf.mxu0 }
 0x29b   : > { %v3222_v27 = vadd.f32 %v3221_v26, %v3220_v25  ;;  %v1771_v25 = vld [vmem:[#allocation10 + $0x2a0] sm:$0xff]  ;;  %v1768_v26 = vld [vmem:[#allocation10 + $0x288] sm:$0xff] }
 0x29c   : > { %v3223_v29 = vpop.f32.mrf.mxu0 }
 0x29d   : > { %v1521_v31 = vadd.f32 %v3222_v27, %v3017_v28  ;;  %v3131_v27 = vcombine.high %v1767_v24, %v1771_v25 }
 0x29e   : > { %v3224_v30 = vpop.f32.mrf.mxu0 }
 0x29f   : > { %v3225_v33 = vadd.f32 %v3224_v30, %v3223_v29  ;;  %v1527_v39 = vmax.f32 %v1521_v31, 0.0  ;;  %v3130_v29 = vcombine.low %v1767_v24, %v1771_v25  ;;  %2523 = vmatprep.subr.bf16.mxu0 %v3131_v27  ;;  %v3095_v24 = vcombine.high %v1729_v16, %v1733_v19  ;;  %v1725_v27 = vld [vmem:[#allocation10 + $0x130] sm:$0xff] }
 0x2a1   : > { %v1524_v34 = vadd.f32 %v3225_v33, %v3017_v28  ;;  %v1772_v28 = vld [vmem:[#allocation10 + $0x2a8] sm:$0xff]  ;;  %2524 = vmatpush2.bf16.msra.mxu0 %v3130_v29  ;;  %v1759_v33 = vld [vmem:[#allocation10 + $0x240] sm:$0xff]  ;;  %v1726_v29 = vld [vmem:[#allocation10 + $0x138] sm:$0xff] }
 0x2a2   : > { %v3132_v30 = vcombine.low %v1768_v26, %v1772_v28  ;;  %v3133_v31 = vcombine.high %v1768_v26, %v1772_v28  ;;  %v1721_v26 = vld [vmem:[#allocation10 + $0x110] sm:$0xff]  ;;  %v1722_v28 = vld [vmem:[#allocation10 + $0x118] sm:$0xff] }
 0x2a3   : > { %v1528_v40 = vmax.f32 %v1524_v34, 0.0  ;;  %v1763_v34 = vld [vmem:[#allocation10 + $0x260] sm:$0xff] }
 0x2a4   : > { %v3123_v37 = vcombine.high %v1759_v33, %v1763_v34 }
 0x2a5   : > { %v1529_v41 = vpack.c.bf16 %v1528_v40, %v1527_v39  ;;  %v1764_v39 = vld [vmem:[#allocation10 + $0x268] sm:$0xff]  ;;  %v3122_v40 = vcombine.low %v1759_v33, %v1763_v34  ;;  %v3087_v33 = vcombine.high %v1721_v26, %v1725_v27  ;;  %v3089_v34 = vcombine.high %v1722_v28, %v1726_v29 }
 0x2a6   : > { %2525 = vmatprep.subr.bf16.mxu0 %v3123_v37  ;;  %v1717_v37 = vld [vmem:[#allocation10 + $0xf0] sm:$0xff] }
 0x2a7   : > { %1671 = vmatmul.mubr.bf16.vlgmr.msra.gmra.mxu1 %v1529_v41  ;;  %v3124_v41 = vcombine.low %v1760_v36, %v1764_v39  ;;  %2526 = vmatpush2.bf16.msra.mxu0 %v3122_v40  ;;  %v1718_v40 = vld [vmem:[#allocation10 + $0xf8] sm:$0xff] }
 0x2a8   : > { %2541 = vmatpush1.bf16.msra.mxu1 %v3108_v38  ;;  %v1696_v38 = vld [vmem:[#allocation10 + $0x48] sm:$0xff] }
 0x2a9   : > { %2542 = vmatprep.subr.bf16.mxu1 %v3101_v42  ;;  %v3061_v62 = vcombine.high %v1696_v38, %v1700_v60  ;;  %v3060_v1 = vcombine.low %v1696_v38, %v1700_v60  ;;  %v3125_v42 = vcombine.high %v1760_v36, %v1764_v39  ;;  %v1546_v38 = vld [vmem:[#allocation11 + $0x3] sm:$0x3]  ;;  %v1713_v36 = vld [vmem:[#allocation10 + $0xd0] sm:$0xff]  ;;  %v1714_v39 = vld [vmem:[#allocation10 + $0xd8] sm:$0xff] }
 0x2ac   : > { %2543 = vmatpush1.bf16.msra.mxu1 %v3100_v47  ;;  %v1752_v47 = vld [vmem:[#allocation10 + $0x208] sm:$0xff] }
 0x2ad   : > { %2544 = vmatprep.subr.bf16.mxu1 %v3093_v49  ;;  %v3115_v49 = vcombine.high %v1751_v44, %v1755_v45  ;;  %v3079_v44 = vcombine.high %v1713_v36, %v1717_v37  ;;  %v3081_v45 = vcombine.high %v1714_v39, %v1718_v40 }
 0x2af   : > { %2527 = vmatprep.subr.bf16.mxu0 %v3115_v49  ;;  %v1709_v49 = vld [vmem:[#allocation10 + $0xb0] sm:$0xff] }
 0x2b0   : > { %2545 = vmatpush1.bf16.msra.mxu1 %v3092_v52  ;;  %v3116_v52 = vcombine.low %v1752_v47, %v1756_v50  ;;  %2528 = vmatpush2.bf16.msra.mxu0 %v3114_v51  ;;  %v1710_v51 = vld [vmem:[#allocation10 + $0xb8] sm:$0xff] }
 0x2b1   : > { %2546 = vmatprep.subr.bf16.mxu1 %v3085_v53  ;;  %v3117_v53 = vcombine.high %v1752_v47, %v1756_v50  ;;  %v1705_v47 = vld [vmem:[#allocation10 + $0x90] sm:$0xff]  ;;  %v1706_v50 = vld [vmem:[#allocation10 + $0x98] sm:$0xff] }
 0x2b4   : > { %2547 = vmatpush1.bf16.msra.mxu1 %v3084_v56  ;;  %v1746_v56 = vld [vmem:[#allocation10 + $0x1d8] sm:$0xff] }
 0x2b5   : > { %2548 = vmatprep.subr.bf16.mxu1 %v3077_v57  ;;  %v3111_v57 = vcombine.high %v1745_v54, %v1749_v55  ;;  %v3071_v54 = vcombine.high %v1705_v47, %v1709_v49  ;;  %v3073_v55 = vcombine.high %v1706_v50, %v1710_v51 }
 0x2b7   : > { %2583 = vmatprep.subr.bf16.mxu0 %v3111_v57  ;;  %v1701_v57 = vld [vmem:[#allocation10 + $0x70] sm:$0xff] }
 0x2b8   : > { %2549 = vmatpush1.bf16.msra.mxu1 %v3076_v32  ;;  %v3112_v32 = vcombine.low %v1746_v56, %v1750_v58 }
 0x2b9   : > { %2550 = vmatprep.subr.bf16.mxu1 %v3069_v35  ;;  %v3113_v35 = vcombine.high %v1746_v56, %v1750_v58  ;;  %v1697_v56 = vld [vmem:[#allocation10 + $0x50] sm:$0xff]  ;;  %v1698_v58 = vld [vmem:[#allocation10 + $0x58] sm:$0xff] }
 0x2bc   : > { %2551 = vmatpush1.bf16.msra.mxu1 %v3068_v61  ;;  %v1555_v61 = vrot.slane %v1546_v38, %v4069_v46 }
 0x2bd   : > { %2552 = vmatprep.subr.bf16.mxu1 %v3061_v62  ;;  %v1551_v62 = vrot.slane %v1546_v38, %v4072_v48  ;;  %v3063_v38 = vcombine.high %v1697_v56, %v1701_v57 }
 0x2c0   : > { %2553 = vmatpush1.bf16.msra.mxu1 %v3060_v1 }
 0x2c1   : > { %2554 = vmatprep.subr.bf16.mxu1 %v3053_v2 }
 0x2c4   : > { %2555 = vmatpush1.bf16.msra.mxu1 %v3052_v5 }
 0x2c5   : > { %2556 = vmatprep.subr.bf16.mxu1 %v3173_v6 }
 0x2c8   : > { %2557 = vmatpush2.bf16.msra.mxu1 %v3172_v9  ;;  %v1737_v9 = vld [vmem:[#allocation10 + $0x190] sm:$0xff] }
 0x2c9   : > { %2558 = vmatprep.subr.bf16.mxu1 %v3165_v10 }
 0x2cc   : > { %2559 = vmatpush2.bf16.msra.mxu1 %v3164_v13  ;;  %v1742_v13 = vld [vmem:[#allocation10 + $0x1b8] sm:$0xff] }
 0x2cd   : > { %2560 = vmatprep.subr.bf16.mxu1 %v3157_v14 }
 0x2d0   : > { %2561 = vmatpush2.bf16.msra.mxu1 %v3156_v17  ;;  %v3103_v17 = vcombine.high %v1737_v9, %v1741_v11 }
 0x2d1   : > { %2562 = vmatprep.subr.bf16.mxu1 %v3149_v18  ;;  %v3105_v18 = vcombine.high %v1738_v12, %v1742_v13 }
 0x2d4   : > { %2563 = vmatpush2.bf16.msra.mxu1 %v3148_v21  ;;  %v1734_v21 = vld [vmem:[#allocation10 + $0x178] sm:$0xff] }
 0x2d5   : > { %2564 = vmatprep.subr.bf16.mxu1 %v3141_v22  ;;  %v3102_v22 = vcombine.low %v1737_v9, %v1741_v11  ;;  %v3097_v25 = vcombine.high %v1730_v20, %v1734_v21 }
 0x2d8   : > { %2565 = vmatpush2.bf16.msra.mxu1 %v3140_v23  ;;  %v3104_v23 = vcombine.low %v1738_v12, %v1742_v13  ;;  %v1801_v13 = vld [vmem:[#allocation10 + $0x390] sm:$0xff] }
 0x2d9   : > { %2566 = vmatprep.subr.bf16.mxu1 %v3133_v31  ;;  %v3096_v31 = vcombine.low %v1730_v20, %v1734_v21 }
 0x2dc   : > { %2567 = vmatpush2.bf16.msra.mxu1 %v3132_v30  ;;  %v3094_v30 = vcombine.low %v1729_v16, %v1733_v19  ;;  %v1802_v16 = vld [vmem:[#allocation10 + $0x398] sm:$0xff] }
 0x2dd   : > { %2568 = vmatprep.subr.bf16.mxu1 %v3125_v42  ;;  %v3088_v42 = vcombine.low %v1722_v28, %v1726_v29 }
 0x2e0   : > { %2569 = vmatpush2.bf16.msra.mxu1 %v3124_v41  ;;  %v3086_v41 = vcombine.low %v1721_v26, %v1725_v27 }
 0x2e1   : > { %2570 = vmatprep.subr.bf16.mxu1 %v3117_v53  ;;  %v3080_v53 = vcombine.low %v1714_v39, %v1718_v40 }
 0x2e4   : > { %2571 = vmatpush2.bf16.msra.mxu1 %v3116_v52  ;;  %v3078_v52 = vcombine.low %v1713_v36, %v1717_v37 }
 0x2e5   : > { %2626 = vmatprep.subr.bf16.mxu1 %v3113_v35  ;;  %v3072_v35 = vcombine.low %v1706_v50, %v1710_v51 }
 0x367   : > { %v1672_v60 = vpop.f32.mrf.mxu1 }
 0x368   : > { %v1673_v3 = vadd.f32 %v1672_v60, %v1551_v62 }
 0x369   : > { %v1674_v63 = vpop.f32.mrf.mxu1 }
 0x36a   : > { %v1675_v1 = vadd.f32 %v1674_v63, %v1555_v61  ;;  %v1681_v10 = vmax.f32 %v1673_v3, 0.0  ;;  %v1690_v63 = vld [vmem:[#allocation10 + $0x18] sm:$0xff] }
 0x36b   : > { %v1676_v0 = vpop.f32.mrf.mxu1 }
 0x36c   : > { %v1677_v2 = vadd.f32 %v1676_v0, %v1551_v62  ;;  %v1682_v7 = vmax.f32 %v1675_v1, 0.0  ;;  %v1693_v62 = vld [vmem:[#allocation10 + $0x30] sm:$0xff]  ;;  %v1694_v0 = vld [vmem:[#allocation10 + $0x38] sm:$0xff]  ;;  %v3062_v1 = vcombine.low %v1697_v56, %v1701_v57 }
 0x36d   : > { %v1678_v4 = vpop.f32.mrf.mxu1 }
 0x36e   : > { %v1679_v5 = vadd.f32 %v1678_v4, %v1555_v61  ;;  %v1683_v6 = vmax.f32 %v1677_v2, 0.0  ;;  %v1689_v61 = vld [vmem:[#allocation10 + $0x10] sm:$0xff]  ;;  %v3057_v4 = vcombine.high %v1690_v63, %v1694_v0 }
 0x36f   : > { %v3055_v3 = vcombine.high %v1689_v61, %v1693_v62  ;;  %v3054_v9 = vcombine.low %v1689_v61, %v1693_v62 }
 0x370   : > { %v1684_v8 = vmax.f32 %v1679_v5, 0.0  ;;  %v4089_v15 = vpack.c.bf16 %v1683_v6, %v1681_v10  ;;  %v1809_v5 = vld [vmem:[#allocation10 + $0x3d0] sm:$0xff]  ;;  %v3056_v10 = vcombine.low %v1690_v63, %v1694_v0 }
 0x371   : > { %v1813_v6 = vld [vmem:[#allocation10 + $0x3f0] sm:$0xff] }
 0x372   : > { %v1686_v14 = vpack.c.bf16 %v1684_v8, %v1682_v7  ;;  %v1810_v7 = vld [vmem:[#allocation10 + $0x3d8] sm:$0xff]  ;;  %v3175_v11 = vcombine.high %v1809_v5, %v1813_v6 }
 0x373   : > { %v1814_v8 = vld [vmem:[#allocation10 + $0x3f8] sm:$0xff] }
 0x374   : > { %2529 = vmatprep.mubr.bf16.mxu0 %v1686_v14  ;;  %2572 = vmatprep.mubr.bf16.mxu1 %v1686_v14  ;;  %v3177_v12 = vcombine.high %v1810_v7, %v1814_v8  ;;  %v3176_v19 = vcombine.low %v1810_v7, %v1814_v8 }
 0x375   : > { %2530 = vmatmul.mubr.bf16.vlgmr.msra.gmra.mxu0 %v4089_v15  ;;  %2573 = vmatmul.mubr.bf16.vlgmr.msra.gmra.mxu1 %v4089_v15 }
 0x376   : > { %2584 = vmatpush1.bf16.msra.mxu0 %v3110_v59  ;;  %2627 = vmatpush1.bf16.msra.mxu1 %v3112_v32  ;;  %v1702_v59 = vld [vmem:[#allocation10 + $0x78] sm:$0xff]  ;;  %v3070_v32 = vcombine.low %v1705_v47, %v1709_v49 }
 0x377   : > { %2615 = vmatprep.mubr.bf16.mxu0 %v1686_v14  ;;  %2658 = vmatprep.mubr.bf16.mxu1 %v1686_v14  ;;  %v3065_v60 = vcombine.high %v1698_v58, %v1702_v59  ;;  %v3064_v2 = vcombine.low %v1698_v58, %v1702_v59  ;;  %v1805_v14 = vld [vmem:[#allocation10 + $0x3b0] sm:$0xff] }
 0x378   : > { %2585 = vmatprep.subr.bf16.mxu0 %v3103_v17  ;;  %2628 = vmatprep.subr.bf16.mxu1 %v3105_v18  ;;  %v1806_v17 = vld [vmem:[#allocation10 + $0x3b8] sm:$0xff]  ;;  %v3174_v18 = vcombine.low %v1809_v5, %v1813_v6  ;;  %v3167_v20 = vcombine.high %v1801_v13, %v1805_v14  ;;  %v3166_v26 = vcombine.low %v1801_v13, %v1805_v14  ;;  %v1815_v13 = vld [vmem:[#allocation11 + $0x5] sm:$0xff] }
 0x379   : > { %v3169_v21 = vcombine.high %v1802_v16, %v1806_v17  ;;  %v3168_v27 = vcombine.low %v1802_v16, %v1806_v17  ;;  %v1820_v14 = vrot.slane %v1815_v13, %v4072_v48  ;;  %v1824_v17 = vrot.slane %v1815_v13, %v4069_v46 }
 0x37a   : > { %2586 = vmatpush1.bf16.msra.mxu0 %v3102_v22  ;;  %2629 = vmatpush1.bf16.msra.mxu1 %v3104_v23  ;;  %v1793_v22 = vld [vmem:[#allocation10 + $0x350] sm:$0xff] }
 0x37b   : > { %2587 = vmatprep.subr.bf16.mxu0 %v3095_v24  ;;  %2630 = vmatprep.subr.bf16.mxu1 %v3097_v25  ;;  %v1797_v23 = vld [vmem:[#allocation10 + $0x370] sm:$0xff]  ;;  %v1794_v24 = vld [vmem:[#allocation10 + $0x358] sm:$0xff] }
 0x37c   : > { %v1798_v25 = vld [vmem:[#allocation10 + $0x378] sm:$0xff]  ;;  %v3159_v28 = vcombine.high %v1793_v22, %v1797_v23  ;;  %v3158_v36 = vcombine.low %v1793_v22, %v1797_v23 }
 0x37d   : > { %v3161_v29 = vcombine.high %v1794_v24, %v1798_v25  ;;  %v3160_v37 = vcombine.low %v1794_v24, %v1798_v25 }
 0x37e   : > { %2588 = vmatpush1.bf16.msra.mxu0 %v3094_v30  ;;  %2631 = vmatpush1.bf16.msra.mxu1 %v3096_v31  ;;  %v1785_v30 = vld [vmem:[#allocation10 + $0x310] sm:$0xff] }
 0x37f   : > { %2589 = vmatprep.subr.bf16.mxu0 %v3087_v33  ;;  %2632 = vmatprep.subr.bf16.mxu1 %v3089_v34  ;;  %v1789_v31 = vld [vmem:[#allocation10 + $0x330] sm:$0xff]  ;;  %v1786_v33 = vld [vmem:[#allocation10 + $0x318] sm:$0xff] }
 0x380   : > { %v1790_v34 = vld [vmem:[#allocation10 + $0x338] sm:$0xff]  ;;  %v3151_v39 = vcombine.high %v1785_v30, %v1789_v31  ;;  %v3150_v47 = vcombine.low %v1785_v30, %v1789_v31 }
 0x381   : > { %v3153_v40 = vcombine.high %v1786_v33, %v1790_v34  ;;  %v3152_v49 = vcombine.low %v1786_v33, %v1790_v34 }
 0x382   : > { %2590 = vmatpush1.bf16.msra.mxu0 %v3086_v41  ;;  %2633 = vmatpush1.bf16.msra.mxu1 %v3088_v42  ;;  %v1777_v41 = vld [vmem:[#allocation10 + $0x2d0] sm:$0xff] }
 0x383   : > { %2591 = vmatprep.subr.bf16.mxu0 %v3079_v44  ;;  %2634 = vmatprep.subr.bf16.mxu1 %v3081_v45  ;;  %v1781_v42 = vld [vmem:[#allocation10 + $0x2f0] sm:$0xff]  ;;  %v1778_v44 = vld [vmem:[#allocation10 + $0x2d8] sm:$0xff] }
 0x384   : > { %v1782_v45 = vld [vmem:[#allocation10 + $0x2f8] sm:$0xff]  ;;  %v3143_v50 = vcombine.high %v1777_v41, %v1781_v42  ;;  %v3142_v56 = vcombine.low %v1777_v41, %v1781_v42  ;;  %v1839_v41 = vsub.s32 5, %v4066_v43  ;;  %v1847_v42 = vsub.s32 7, %v4066_v43 }
 0x385   : > { %v3145_v51 = vcombine.high %v1778_v44, %v1782_v45  ;;  %v3144_v57 = vcombine.low %v1778_v44, %v1782_v45 }
 0x386   : > { %2592 = vmatpush1.bf16.msra.mxu0 %v3078_v52  ;;  %2635 = vmatpush1.bf16.msra.mxu1 %v3080_v53  ;;  %v1769_v52 = vld [vmem:[#allocation10 + $0x290] sm:$0xff] }
 0x387   : > { %2593 = vmatprep.subr.bf16.mxu0 %v3071_v54  ;;  %2636 = vmatprep.subr.bf16.mxu1 %v3073_v55  ;;  %v1773_v53 = vld [vmem:[#allocation10 + $0x2b0] sm:$0xff]  ;;  %v1770_v54 = vld [vmem:[#allocation10 + $0x298] sm:$0xff] }
 0x388   : > { %v1774_v55 = vld [vmem:[#allocation10 + $0x2b8] sm:$0xff]  ;;  %v3135_v58 = vcombine.high %v1769_v52, %v1773_v53  ;;  %v3134_v61 = vcombine.low %v1769_v52, %v1773_v53 }
 0x389   : > { %v3137_v59 = vcombine.high %v1770_v54, %v1774_v55  ;;  %v3136_v62 = vcombine.low %v1770_v54, %v1774_v55 }
 0x38a   : > { %2594 = vmatpush1.bf16.msra.mxu0 %v3070_v32  ;;  %2637 = vmatpush1.bf16.msra.mxu1 %v3072_v35  ;;  %v1761_v32 = vld [vmem:[#allocation10 + $0x250] sm:$0xff] }
 0x38b   : > { %2595 = vmatprep.subr.bf16.mxu0 %v3063_v38  ;;  %2638 = vmatprep.subr.bf16.mxu1 %v3065_v60  ;;  %v1765_v35 = vld [vmem:[#allocation10 + $0x270] sm:$0xff]  ;;  %v1762_v38 = vld [vmem:[#allocation10 + $0x258] sm:$0xff] }
 0x38c   : > { %v1766_v60 = vld [vmem:[#allocation10 + $0x278] sm:$0xff]  ;;  %v3127_v63 = vcombine.high %v1761_v32, %v1765_v35  ;;  %v3126_v5 = vcombine.low %v1761_v32, %v1765_v35 }
 0x38d   : > { %v3129_v0 = vcombine.high %v1762_v38, %v1766_v60  ;;  %v3128_v6 = vcombine.low %v1762_v38, %v1766_v60 }
 0x38e   : > { %2596 = vmatpush1.bf16.msra.mxu0 %v3062_v1  ;;  %2639 = vmatpush1.bf16.msra.mxu1 %v3064_v2  ;;  %v1753_v1 = vld [vmem:[#allocation10 + $0x210] sm:$0xff] }
 0x38f   : > { %2597 = vmatprep.subr.bf16.mxu0 %v3055_v3  ;;  %2640 = vmatprep.subr.bf16.mxu1 %v3057_v4  ;;  %v1757_v2 = vld [vmem:[#allocation10 + $0x230] sm:$0xff]  ;;  %v1754_v3 = vld [vmem:[#allocation10 + $0x218] sm:$0xff] }
 0x390   : > { %v1758_v4 = vld [vmem:[#allocation10 + $0x238] sm:$0xff]  ;;  %v3119_v7 = vcombine.high %v1753_v1, %v1757_v2 }
 0x391   : > { %v3121_v8 = vcombine.high %v1754_v3, %v1758_v4 }
 0x392   : > { %2598 = vmatpush1.bf16.msra.mxu0 %v3054_v9  ;;  %2641 = vmatpush1.bf16.msra.mxu1 %v3056_v10  ;;  %v3118_v9 = vcombine.low %v1753_v1, %v1757_v2  ;;  %v3120_v10 = vcombine.low %v1754_v3, %v1758_v4 }
 0x393   : > { %2599 = vmatprep.subr.bf16.mxu0 %v3175_v11  ;;  %2642 = vmatprep.subr.bf16.mxu1 %v3177_v12  ;;  %v1827_v11 = vsub.s32 2, %v4066_v43  ;;  %v1831_v12 = vsub.s32 3, %v4066_v43 }
 0x395   : > { %v1828_v16 = vrot.slane %v1815_v13, %v1827_v11 }
 0x396   : > { %2600 = vmatpush2.bf16.msra.mxu0 %v3174_v18  ;;  %2643 = vmatpush2.bf16.msra.mxu1 %v3176_v19  ;;  %v1832_v18 = vrot.slane %v1815_v13, %v1831_v12 }
 0x397   : > { %2601 = vmatprep.subr.bf16.mxu0 %v3167_v20  ;;  %2644 = vmatprep.subr.bf16.mxu1 %v3169_v21 }
 0x39a   : > { %2602 = vmatpush2.bf16.msra.mxu0 %v3166_v26  ;;  %2645 = vmatpush2.bf16.msra.mxu1 %v3168_v27 }
 0x39b   : > { %2603 = vmatprep.subr.bf16.mxu0 %v3159_v28  ;;  %2646 = vmatprep.subr.bf16.mxu1 %v3161_v29 }
 0x39e   : > { %2604 = vmatpush2.bf16.msra.mxu0 %v3158_v36  ;;  %2647 = vmatpush2.bf16.msra.mxu1 %v3160_v37 }
 0x39f   : > { %2605 = vmatprep.subr.bf16.mxu0 %v3151_v39  ;;  %2648 = vmatprep.subr.bf16.mxu1 %v3153_v40  ;;  %v1835_v39 = vsub.s32 4, %v4066_v43  ;;  %v1843_v40 = vsub.s32 6, %v4066_v43 }
 0x3a1   : > { %v1836_v44 = vrot.slane %v1815_v13, %v1835_v39  ;;  %v1844_v45 = vrot.slane %v1815_v13, %v1843_v40 }
 0x3a2   : > { %2606 = vmatpush2.bf16.msra.mxu0 %v3150_v47  ;;  %2649 = vmatpush2.bf16.msra.mxu1 %v3152_v49  ;;  %v1840_v47 = vrot.slane %v1815_v13, %v1839_v41  ;;  %v1848_v49 = vrot.slane %v1815_v13, %v1847_v42 }
 0x3a3   : > { %2607 = vmatprep.subr.bf16.mxu0 %v3143_v50  ;;  %2650 = vmatprep.subr.bf16.mxu1 %v3145_v51 }
 0x3a6   : > { %2608 = vmatpush2.bf16.msra.mxu0 %v3142_v56  ;;  %2651 = vmatpush2.bf16.msra.mxu1 %v3144_v57 }
 0x3a7   : > { %2609 = vmatprep.subr.bf16.mxu0 %v3135_v58  ;;  %2652 = vmatprep.subr.bf16.mxu1 %v3137_v59 }
 0x3aa   : > { %2610 = vmatpush2.bf16.msra.mxu0 %v3134_v61  ;;  %2653 = vmatpush2.bf16.msra.mxu1 %v3136_v62 }
 0x3ab   : > { %2611 = vmatprep.subr.bf16.mxu0 %v3127_v63  ;;  %2654 = vmatprep.subr.bf16.mxu1 %v3129_v0 }
 0x3ae   : > { %2612 = vmatpush2.bf16.msra.mxu0 %v3126_v5  ;;  %2655 = vmatpush2.bf16.msra.mxu1 %v3128_v6 }
 0x3af   : > { %2613 = vmatprep.subr.bf16.mxu0 %v3119_v7  ;;  %2656 = vmatprep.subr.bf16.mxu1 %v3121_v8 }
 0x3b2   : > { %2614 = vmatpush2.bf16.msra.mxu0 %v3118_v9  ;;  %2657 = vmatpush2.bf16.msra.mxu1 %v3120_v10 }
 0x3b5   : > { %2616 = vmatmul.mubr.bf16.vlgmr.msra.gmra.mxu0 %v4089_v15  ;;  %2659 = vmatmul.mubr.bf16.vlgmr.msra.gmra.mxu1 %v4089_v15 }
 0x435   : > { %v2531_v19 = vpop.f32.mrf.mxu0  ;;  %v2574_v20 = vpop.f32.mrf.mxu1 }
 0x436   : > { %v2532_v23 = vadd.f32 %v2531_v19, %v1820_v14  ;;  %v2575_v24 = vadd.f32 %v2574_v20, %v1828_v16 }
 0x437   : > { %v2533_v21 = vpop.f32.mrf.mxu0  ;;  %v2576_v22 = vpop.f32.mrf.mxu1 }
 0x438   : > { %v2534_v25 = vadd.f32 %v2533_v21, %v1824_v17  ;;  %v2577_v15 = vadd.f32 %v2576_v22, %v1832_v18 }
 0x439   : > { %v2535_v26 = vpop.f32.mrf.mxu0  ;;  %v2578_v27 = vpop.f32.mrf.mxu1 }
 0x43a   : > { %v3194_v28 = vpack.c.bf16 %v2534_v25, %v2532_v23  ;;  %v3195_v29 = vpack.c.bf16 %v2577_v15, %v2575_v24  ;;  %v2536_v46 = vadd.f32 %v2535_v26, %v1820_v14  ;;  %v2579_v48 = vadd.f32 %v2578_v27, %v1828_v16 }
 0x43b   : > { %v2537_v30 = vpop.f32.mrf.mxu0  ;;  %v2580_v31 = vpop.f32.mrf.mxu1 }
 0x43c   : > { %2717 = vst [vmem:[%s4101_s28] sm:$0xff] %v3194_v28  ;;  %2718 = vst [vmem:[%s4101_s28 + $0x8] sm:$0xff] %v3195_v29  ;;  %v2538_v33 = vadd.f32 %v2537_v30, %v1824_v17  ;;  %v2581_v34 = vadd.f32 %v2580_v31, %v1832_v18 }
 0x43e   : > { %v3198_v36 = vpack.c.bf16 %v2538_v33, %v2536_v46  ;;  %v3199_v37 = vpack.c.bf16 %v2581_v34, %v2579_v48 }
 0x440   : > { %2721 = vst [vmem:[%s4101_s28 + $0x20] sm:$0xff] %v3198_v36  ;;  %2722 = vst [vmem:[%s4101_s28 + $0x28] sm:$0xff] %v3199_v37 }
 0x475   : > { %v2617_v50 = vpop.f32.mrf.mxu0  ;;  %v2660_v51 = vpop.f32.mrf.mxu1 }
 0x476   : > { %v2618_v54 = vadd.f32 %v2617_v50, %v1836_v44  ;;  %v2661_v55 = vadd.f32 %v2660_v51, %v1844_v45 }
 0x477   : > { %v2619_v52 = vpop.f32.mrf.mxu0  ;;  %v2662_v53 = vpop.f32.mrf.mxu1 }
 0x478   : > { %v2620_v56 = vadd.f32 %v2619_v52, %v1840_v47  ;;  %v2663_v57 = vadd.f32 %v2662_v53, %v1848_v49 }
 0x479   : > { %v2621_v58 = vpop.f32.mrf.mxu0  ;;  %v2664_v59 = vpop.f32.mrf.mxu1 }
 0x47a   : > { %v3196_v43 = vpack.c.bf16 %v2620_v56, %v2618_v54  ;;  %v3197_v32 = vpack.c.bf16 %v2663_v57, %v2661_v55  ;;  %v2622_v60 = vadd.f32 %v2621_v58, %v1836_v44  ;;  %v2665_v61 = vadd.f32 %v2664_v59, %v1844_v45 }
 0x47b   : > { %v2623_v35 = vpop.f32.mrf.mxu0  ;;  %v2666_v38 = vpop.f32.mrf.mxu1 }
 0x47c   : > { %2719 = vst [vmem:[%s4101_s28 + $0x10] sm:$0xff] %v3196_v43  ;;  %2720 = vst [vmem:[%s4101_s28 + $0x18] sm:$0xff] %v3197_v32  ;;  %v2624_v62 = vadd.f32 %v2623_v35, %v1840_v47  ;;  %v2667_v63 = vadd.f32 %v2666_v38, %v1848_v49 }
 0x47e   : > { %v3200_v0 = vpack.c.bf16 %v2624_v62, %v2622_v60  ;;  %v3201_v1 = vpack.c.bf16 %v2667_v63, %v2665_v61 }
 0x480   : > { %2723 = vst [vmem:[%s4101_s28 + $0x30] sm:$0xff] %v3200_v0  ;;  %2724 = vst [vmem:[%s4101_s28 + $0x38] sm:$0xff] %v3201_v1 }
 0x481   : > { %3735 = shalt.err (!%p3732_p3)
}
 0x482   : > { %s3736_s16 = scalar_lea.hbm %s4120_s17, 1024  ;;  %s3740_s10 = scalar_lea.hbm %s4170_s6, 4096 }
 0x483   : > { %p3737_p7 = scmp.ne.s32.totalorder %s4120_s17, %s3736_s16  ;;  %p3741_p11 = scmp.lt.s32.totalorder %s4120_s17, %s4170_s6 }
 0x484   : > { %p3742_p12 = scmp.lt.s32.totalorder %s3740_s10, %s3736_s16 }
 0x485   : > { %p3738_p5 = pnand %p3737_p7, %p4194_p4 }
 0x486   : > { %p3743_p0 = por %p3742_p12, %p3741_p11 }
 0x487   : > { %p3739_p10 = pneg %p3738_p5 }
 0x489   : > { %p3744_p2 = pnand %p3743_p0, %p3739_p10 }
 0x48b   : > { %3747 = shalt.err (!%p3744_p2)
}
 0x48c   : > { %s3814_s20 = smov 512   ;;  %s3815_s25 = smov 32  }
 0x48d   : > { %3248 = dma.vmem_to_hbm [thread:$0]  (%p4194_p4), %s4113_s30, 1024, %s4120_s17, %s2726_s27, %s3814_s20, %s3814_s20, %s3815_s25  }
 0x48e PF: > { %p3285_p8 = scmp.ge.s32.totalorder %s3798_s24, 2  ;;  %s2755_s19 = sand.u32 1, %s3786_s21  }
 0x48f   : > { %p4195_p9 = scmp.ne.s32.totalorder %s4182_s9, 0  ;;  %s2756_s11 = scalar_lea.sflag [#allocation4], %s2755_s19 }
 0x491   : > { %p3271_p6 = pnand %p3285_p8, %p4195_p9 }
 0x493   : > { %p3272_p13 = pneg %p3271_p6 }
 0x495   : > { %3781 = dma.done.wait (%p3272_p13), %s2756_s11, 1024  }
 0x496   : > { %3783 = vsyncadd (%p3272_p13), %s2756_s11, 4294966272  ;;  %p22_p1 = scmp.ge.s32.totalorder %s3949_s7, 6   ;;  %s4196_s21 = smov %s3790_s22 }
 0x497   : > { %s4197_s22 = smov %s3794_s23  ;;  %s4198_s23 = smov %s3961_s29 }
 0x498   : > { %s4199_s24 = smov %s3949_s7  ;;  %24 = sbr.rel (!%p22_p1) target bundleno = 8 (0x8), region = 109 }
 0x49d   :  { %2761 = vsyncpa [#allocation3], 1 }
 0x49e   :  { %2763 = vsyncpa [#allocation3 + $0x1], 1 }
 0x49f   :  { %2764 = vsyncpa [#allocation6], 1 }
 0x4a0   :  { %2765 = vsyncpa [#allocation9], 1 }
 0x4a1   :  { %2766 = vsyncpa [#allocation12], 1 }
 0x4a2   :  { %2767 = vsyncpa [#allocation4], 1 }
 0x4a3   :  { %2769 = vsyncpa [#allocation4 + $0x1], 1 }

</bundles_post_ra>
